<compile_context>
chip_gen: v7x
topology: tpu7x:2x2x1
jax: 0.10.0
libtpu: 0.0.40
codegen_flags: <defaults>
</compile_context>

<pallas_src>
import functools

import numpy as np
import jax
import jax.numpy as jnp
from jax.experimental import pallas as pl
from jax.experimental.pallas import tpu as pltpu


def _round_up(v, m):
    return ((v + m - 1) // m) * m


# ---------------------------------------------------------------------------
# Fused decoder kernel (single gridless invocation, everything resident in VMEM)
# ---------------------------------------------------------------------------
def _decoder_kernel(x_ref, wfc_ref, bfc_ref,
                    w1_ref, b1_ref, w2_ref, b2_ref,
                    w3_ref, b3_ref, w5_ref, b5_ref,
                    o_ref, p12, p5,
                    *, B, C, h):
    H1 = h                      # 8
    H2 = 2 * h                  # 16
    WC = h * C                  # 128  interior row width, cols = x*C + c (lane-0 aligned)
    WC2 = 2 * h * C             # 256
    f32 = jnp.float32
    bf16 = jnp.bfloat16

    def band_conv3x3(p_ref, w_ref, b_ref, H, rows):
        # One fused matmul per layer: LHS row (b, y) = [padrow(y) | padrow(y+1) | padrow(y+2)]
        RW = p_ref.shape[2]
        lhs = jnp.concatenate(
            [p_ref[:, ky:ky + H, :].reshape(rows, RW) for ky in range(3)], axis=1)
        return jnp.dot(lhs.astype(bf16), w_ref[...],
                       preferred_element_type=f32) + b_ref[...]

    # ---- fc4 + ReLU ---------------------------------------------------------
    fc = jnp.dot(x_ref[...].astype(bf16), wfc_ref[...], preferred_element_type=f32)
    fc = jnp.maximum(fc + bfc_ref[...], 0.0)          # (B, h*h*C), cols ordered (y, x, c)

    # ---- deconv1 (3x3, s1, p1) + ReLU ---------------------------------------
    p12[...] = jnp.zeros_like(p12)                    # zero pad border once (buffer reused)
    p12[:, 1:1 + H1, :WC] = fc.reshape(B, H1, WC)     # single lane-0-aligned store
    a1 = jnp.maximum(band_conv3x3(p12, w1_ref, b1_ref, H1, B * H1), 0.0)   # (B*h, WC)

    # ---- deconv2 (3x3, s1, p1) + ReLU (same scratch; border already zero) ---
    p12[:, 1:1 + H1, :WC] = a1.reshape(B, H1, WC)
    a2 = jnp.maximum(band_conv3x3(p12, w2_ref, b2_ref, H1, B * H1), 0.0)   # (B*h, WC)

    # ---- deconv3 (2x2, s2) + ReLU: one matmul with [even | odd] columns -----
    u = jnp.maximum(
        jnp.dot(a2.astype(bf16), w3_ref[...], preferred_element_type=f32) + b3_ref[...],
        0.0)                                          # (B*h, 2*WC2)
    p5[...] = jnp.zeros_like(p5)
    # row-major reshape interleaves even/odd output rows -> single store
    p5[:, 1:1 + H2, :WC2] = u.reshape(B, H2, WC2)

    # ---- conv5 (3x3, s1, p1) + Sigmoid, cols ordered (x, c_out) -------------
    z = band_conv3x3(p5, w5_ref, b5_ref, H2, B * H2)  # (B*2h, 2h*c_out)
    o_ref[...] = 0.5 * (jnp.tanh(0.5 * z) + 1.0)      # sigmoid via EUP tanh


@functools.partial(jax.jit, static_argnums=(2,))
def liutkus_decoder_forward(x, prep, output_shape):
    c_out, _, d = output_shape
    h = d // 2
    H2 = 2 * h
    B = x.shape[0]
    RW1 = _round_up((h + 2) * d, 128)
    RW2 = _round_up((H2 + 2) * d, 128)

    kernel = functools.partial(_decoder_kernel, B=B, C=d, h=h)
    # Gridless call: whole problem (< 1 MiB incl. bf16 weights) lives in VMEM.
    # NOTE: at larger batch, add a batch grid axis + dimension_semantics=("parallel",)
    # to engage the second TensorCore on v7x; at B=2 it would only add overhead.
    z = pl.pallas_call(
        kernel,
        out_shape=jax.ShapeDtypeStruct((B * H2, H2 * c_out), jnp.float32),
        scratch_shapes=[
            pltpu.VMEM((B, h + 2, RW1), jnp.float32),    # shared pad buf for deconv1/2
            pltpu.VMEM((B, H2 + 2, RW2), jnp.float32),   # pad buf for conv5
        ],
    )(x, prep["wfc"], prep["bfc"],
      prep["w1"], prep["b1"], prep["w2"], prep["b2"],
      prep["w3"], prep["b3"], prep["w5"], prep["b5"])

    # tiny (8 KB) NHWC-ish -> NCHW permute outside the kernel
    return z.reshape(B, H2, H2, c_out).transpose(0, 3, 1, 2)


# ---------------------------------------------------------------------------
# One-time host-side weight folding (PyTorch conventions -> fused banded matmul form)
# ---------------------------------------------------------------------------
def _deconv3x3_taps(w):
    # ConvTranspose2d(s=1,p=1) weight (Ci, Co, 3, 3) == conv with flipped kernel and
    # swapped channels: taps[ky, kx, ci, co] = w[ci, co, 2-ky, 2-kx]
    return np.transpose(w[:, :, ::-1, ::-1], (2, 3, 0, 1)).copy()


def _conv3x3_taps(w):
    # Conv2d weight (Co, Ci, 3, 3) -> taps[ky, kx, ci, co]
    return np.transpose(w, (2, 3, 1, 0)).copy()


def _band3x3_fused(taps, W, RW):
    # Fused banded weights, K rows = [padrow(y) | padrow(y+1) | padrow(y+2)], each RW wide.
    # Data columns are x*Ci + ci for x in [0, W); x-pad / alignment-pad columns (>= W*Ci)
    # get zero weight rows, so pad columns never contribute.
    _, _, Ci, Co = taps.shape
    w = np.zeros((3, RW, W * Co), np.float32)
    for ky in range(3):
        for kx in range(3):
            for xo in range(W):
                xi = xo + kx - 1
                if 0 <= xi < W:
                    w[ky, xi * Ci:(xi + 1) * Ci, xo * Co:(xo + 1) * Co] = taps[ky, kx]
    return w.reshape(3 * RW, W * Co)


def _band2x2_s2(w, W):
    # ConvTranspose2d(s=2, p=0) weight (Ci, Co, 2, 2) -> one matmul whose columns are
    # [even output rows | odd output rows], each block ordered (x_out, co).
    Ci, Co = w.shape[0], w.shape[1]
    band = np.zeros((W * Ci, 2, 2 * W * Co), np.float32)
    for x in range(W):
        for kx in range(2):
            xo = 2 * x + kx
            for ky in range(2):
                band[x * Ci:(x + 1) * Ci, ky, xo * Co:(xo + 1) * Co] = w[:, :, ky, kx]
    return band.reshape(W * Ci, 2 * 2 * W * Co)


def prepare_params(params, in_size, output_shape):
    c_out, _, d = output_shape
    h = d // 2
    W1, W2 = h, 2 * h
    RW1 = _round_up((W1 + 2) * d, 128)
    RW2 = _round_up((W2 + 2) * d, 128)
    p = {k: np.asarray(v, np.float32) for k, v in params.items()}

    # fc4: reorder output columns from (c, y, x) [torch .view(-1, d, h, h)] to (y, x, c)
    wfc = (p["fc_w"].reshape(d, h, h, in_size).transpose(1, 2, 0, 3)
           .reshape(h * h * d, in_size).T)
    bfc = p["fc_b"].reshape(d, h, h).transpose(1, 2, 0).reshape(1, h * h * d)

    w1 = _band3x3_fused(_deconv3x3_taps(p["dc1_w"]), W1, RW1)     # (3*RW1, W1*d)
    b1 = np.tile(p["dc1_b"], W1).reshape(1, W1 * d)               # cols (x, c)
    w2 = _band3x3_fused(_deconv3x3_taps(p["dc2_w"]), W1, RW1)
    b2 = np.tile(p["dc2_b"], W1).reshape(1, W1 * d)

    w3 = _band2x2_s2(p["dc3_w"], W1)                              # (W1*d, 2*W2*d)
    b3 = np.tile(p["dc3_b"], 2 * W2).reshape(1, 2 * W2 * d)

    w5 = _band3x3_fused(_conv3x3_taps(p["c5_w"]), W2, RW2)        # (3*RW2, W2*c_out)
    b5 = np.tile(p["c5_b"], W2).reshape(1, W2 * c_out)            # cols (x, c_out)

    weights = dict(wfc=wfc, w1=w1, w2=w2, w3=w3, w5=w5)
    biases = dict(bfc=bfc, b1=b1, b2=b2, b3=b3, b5=b5)
    prep = {k: jnp.asarray(v, jnp.bfloat16) for k, v in weights.items()}
    prep.update({k: jnp.asarray(v, jnp.float32) for k, v in biases.items()})
    return prep


# ---------------------------------------------------------------------------
# Deterministic parameter init (PyTorch weight shape conventions)
# ---------------------------------------------------------------------------
def init_params(key, in_size, output_shape):
    c_out, _, d = output_shape
    h = d // 2
    ks = jax.random.split(key, 10)

    def w(k, shape, fan_in):
        return jax.random.normal(k, shape, jnp.float32) / np.sqrt(fan_in)

    fc_out = h * h * d
    return {
        "fc_w": w(ks[0], (fc_out, in_size), in_size),     # nn.Linear: (out, in)
        "fc_b": w(ks[1], (fc_out,), in_size),
        "dc1_w": w(ks[2], (d, d, 3, 3), d * 9),           # ConvTranspose2d: (Cin, Cout, k, k)
        "dc1_b": w(ks[3], (d,), d * 9),
        "dc2_w": w(ks[4], (d, d, 3, 3), d * 9),
        "dc2_b": w(ks[5], (d,), d * 9),
        "dc3_w": w(ks[6], (d, d, 2, 2), d * 4),
        "dc3_b": w(ks[7], (d,), d * 4),
        "c5_w": w(ks[8], (c_out, d, 3, 3), d * 9),        # Conv2d: (Cout, Cin, k, k)
        "c5_b": w(ks[9], (c_out,), d * 9),
    }


# ---------------------------------------------------------------------------
# Independent numpy reference implementing the PyTorch op definitions directly
# ---------------------------------------------------------------------------
def _np_conv_transpose2d(x, w, b, stride, padding):
    B, Cin, H, W = x.shape
    _, Cout, kH, kW = w.shape
    Hout = (H - 1) * stride - 2 * padding + kH
    Wout = (W - 1) * stride - 2 * padding + kW
    out = np.zeros((B, Cout, Hout, Wout), np.float64)
    for n in range(B):
        for ci in range(Cin):
            for i in range(H):
                for j in range(W):
                    for ky in range(kH):
                        for kx in range(kW):
                            oy = stride * i - padding + ky
                            ox = stride * j - padding + kx
                            if 0 <= oy < Hout and 0 <= ox < Wout:
                                out[n, :, oy, ox] += x[n, ci, i, j] * w[ci, :, ky, kx]
    return out + b[None, :, None, None]


def _np_conv2d(x, w, b, padding):
    B, Cin, H, W = x.shape
    Cout, _, kH, kW = w.shape
    xp = np.pad(x, ((0, 0), (0, 0), (padding, padding), (padding, padding)))
    out = np.zeros((B, Cout, H, W), np.float64)
    for oy in range(H):
        for ox in range(W):
            patch = xp[:, :, oy:oy + kH, ox:ox + kW]
            out[:, :, oy, ox] = np.einsum("ncij,ocij->no", patch, w)
    return out + b[None, :, None, None]


def reference_forward_np(x, params, output_shape):
    p = {k: np.asarray(v, np.float64) for k, v in params.items()}
    d = output_shape[-1]
    h = d // 2
    out = np.maximum(np.asarray(x, np.float64) @ p["fc_w"].T + p["fc_b"], 0.0)
    out = out.reshape(-1, d, h, h)
    out = np.maximum(_np_conv_transpose2d(out, p["dc1_w"], p["dc1_b"], 1, 1), 0.0)
    out = np.maximum(_np_conv_transpose2d(out, p["dc2_w"], p["dc2_b"], 1, 1), 0.0)
    out = np.maximum(_np_conv_transpose2d(out, p["dc3_w"], p["dc3_b"], 2, 0), 0.0)
    out = _np_conv2d(out, p["c5_w"], p["c5_b"], 1)
    return 1.0 / (1.0 + np.exp(-out))


# ---------------------------------------------------------------------------
if __name__ == "__main__":
    in_size = 32
    output_shape = (4, 16, 16)   # (C_out, H, W); d = 16, intermediate spatial = 8x8
    batch = 2

    key = jax.random.PRNGKey(0)
    kx, kp = jax.random.split(key)
    x = jax.random.normal(kx, (batch, in_size), jnp.float32)
    params = init_params(kp, in_size, output_shape)

    prep = prepare_params(params, in_size, output_shape)   # one-time host-side folding

    y = liutkus_decoder_forward(x, prep, output_shape)
    y = jax.block_until_ready(y)
    assert y.shape == (batch,) + output_shape, y.shape

    y_ref = reference_forward_np(np.asarray(x), params, output_shape)
    # bf16 operand rounding through 5 chained layers -> percent-level error on the
    # pre-sigmoid logits; a real indexing / weight-folding bug would give O(0.3+) errors.
    np.testing.assert_allclose(np.asarray(y), y_ref, rtol=5e-2, atol=2e-2)

    print("KERNEL_OK")
</pallas_src>

<mosaic_0001>
module attributes {stable_mosaic.version = 11 : i64} {
  func.func @_decoder_kernel(%arg0: memref<2x32xf32, #tpu.memory_space<vmem>>, %arg1: memref<32x1024xbf16, #tpu.memory_space<vmem>>, %arg2: memref<1x1024xf32, #tpu.memory_space<vmem>>, %arg3: memref<768x128xbf16, #tpu.memory_space<vmem>>, %arg4: memref<1x128xf32, #tpu.memory_space<vmem>>, %arg5: memref<768x128xbf16, #tpu.memory_space<vmem>>, %arg6: memref<1x128xf32, #tpu.memory_space<vmem>>, %arg7: memref<128x512xbf16, #tpu.memory_space<vmem>>, %arg8: memref<1x512xf32, #tpu.memory_space<vmem>>, %arg9: memref<1152x64xbf16, #tpu.memory_space<vmem>>, %arg10: memref<1x64xf32, #tpu.memory_space<vmem>>, %arg11: memref<32x64xf32, #tpu.memory_space<vmem>>, %arg12: memref<2x10x256xf32, #tpu.memory_space<vmem>>, %arg13: memref<2x18x384xf32, #tpu.memory_space<vmem>>) attributes {dimension_semantics = [], scalar_prefetch = 0 : i64, scratch_operands = 2 : i64, tpu.core_type = #tpu.core_type<tc>} {
    %c0 = arith.constant 0 : index
    %c0_0 = arith.constant 0 : index
    %0 = vector.load %arg0[%c0, %c0_0] : memref<2x32xf32, #tpu.memory_space<vmem>>, vector<2x32xf32>
    %1 = arith.truncf %0 : vector<2x32xf32> to vector<2x32xbf16>
    %c0_1 = arith.constant 0 : index
    %c0_2 = arith.constant 0 : index
    %2 = vector.load %arg1[%c0_1, %c0_2] : memref<32x1024xbf16, #tpu.memory_space<vmem>>, vector<32x1024xbf16>
    %cst = arith.constant dense<0.000000e+00> : vector<2x1024xf32>
    %3 = tpu.matmul %1, %2, %cst {dimension_numbers = #tpu.dot_dimension_numbers<[1], [0], [0], [1], [0, 0, 1, 1], [], []>} : vector<2x32xbf16>, vector<32x1024xbf16>, vector<2x1024xf32> -> vector<2x1024xf32>
    %c0_3 = arith.constant 0 : index
    %c0_4 = arith.constant 0 : index
    %4 = vector.load %arg2[%c0_3, %c0_4] : memref<1x1024xf32, #tpu.memory_space<vmem>>, vector<1x1024xf32>
    %5 = vector.broadcast %4 : vector<1x1024xf32> to vector<2x1024xf32>
    %6 = arith.addf %3, %5 : vector<2x1024xf32>
    %cst_5 = arith.constant 0.000000e+00 : f32
    %7 = vector.broadcast %cst_5 : f32 to vector<2x1024xf32>
    %8 = arith.maximumf %6, %7 : vector<2x1024xf32>
    %cst_6 = arith.constant 0.000000e+00 : f32
    %9 = vector.broadcast %cst_6 : f32 to vector<2x10x256xf32>
    %c0_7 = arith.constant 0 : index
    %c0_8 = arith.constant 0 : index
    %c0_9 = arith.constant 0 : index
    %10 = vector.load %arg12[%c0_7, %c0_8, %c0_9] : memref<2x10x256xf32, #tpu.memory_space<vmem>>, vector<2x10x256xf32>
    tpu.vector_store %arg12[%c0_7, %c0_8, %c0_9], %9 {strides = array<i32>} : memref<2x10x256xf32, #tpu.memory_space<vmem>>, vector<2x10x256xf32>,
    %11 = vector.shape_cast %8 : vector<2x1024xf32> to vector<2x8x128xf32>
    %c0_10 = arith.constant 0 : index
    %c1 = arith.constant 1 : index
    %c0_11 = arith.constant 0 : index
    %12 = vector.load %arg12[%c0_10, %c1, %c0_11] : memref<2x10x256xf32, #tpu.memory_space<vmem>>, vector<2x8x128xf32>
    tpu.vector_store %arg12[%c0_10, %c1, %c0_11], %11 {strides = array<i32>} : memref<2x10x256xf32, #tpu.memory_space<vmem>>, vector<2x8x128xf32>,
    %c0_12 = arith.constant 0 : index
    %c0_13 = arith.constant 0 : index
    %c0_14 = arith.constant 0 : index
    %13 = vector.load %arg12[%c0_12, %c0_13, %c0_14] : memref<2x10x256xf32, #tpu.memory_space<vmem>>, vector<2x8x256xf32>
    %14 = vector.shape_cast %13 : vector<2x8x256xf32> to vector<16x256xf32>
    %c0_15 = arith.constant 0 : index
    %c1_16 = arith.constant 1 : index
    %c0_17 = arith.constant 0 : index
    %15 = vector.load %arg12[%c0_15, %c1_16, %c0_17] : memref<2x10x256xf32, #tpu.memory_space<vmem>>, vector<2x8x256xf32>
    %16 = vector.shape_cast %15 : vector<2x8x256xf32> to vector<16x256xf32>
    %c0_18 = arith.constant 0 : index
    %c2 = arith.constant 2 : index
    %c0_19 = arith.constant 0 : index
    %17 = vector.load %arg12[%c0_18, %c2, %c0_19] : memref<2x10x256xf32, #tpu.memory_space<vmem>>, vector<2x8x256xf32>
    %18 = vector.shape_cast %17 : vector<2x8x256xf32> to vector<16x256xf32>
    %19 = tpu.concatenate %14, %16, %18 in 1 : vector<16x256xf32>, vector<16x256xf32>, vector<16x256xf32> -> vector<16x768xf32>
    %20 = arith.truncf %19 : vector<16x768xf32> to vector<16x768xbf16>
    %c0_20 = arith.constant 0 : index
    %c0_21 = arith.constant 0 : index
    %21 = vector.load %arg3[%c0_20, %c0_21] : memref<768x128xbf16, #tpu.memory_space<vmem>>, vector<768x128xbf16>
    %cst_22 = arith.constant dense<0.000000e+00> : vector<16x128xf32>
    %22 = tpu.matmul %20, %21, %cst_22 {dimension_numbers = #tpu.dot_dimension_numbers<[1], [0], [0], [1], [0, 0, 1, 1], [], []>} : vector<16x768xbf16>, vector<768x128xbf16>, vector<16x128xf32> -> vector<16x128xf32>
    %c0_23 = arith.constant 0 : index
    %c0_24 = arith.constant 0 : index
    %23 = vector.load %arg4[%c0_23, %c0_24] : memref<1x128xf32, #tpu.memory_space<vmem>>, vector<1x128xf32>
    %24 = vector.broadcast %23 : vector<1x128xf32> to vector<16x128xf32>
    %25 = arith.addf %22, %24 : vector<16x128xf32>
    %cst_25 = arith.constant 0.000000e+00 : f32
    %26 = vector.broadcast %cst_25 : f32 to vector<16x128xf32>
    %27 = arith.maximumf %25, %26 : vector<16x128xf32>
    %28 = vector.shape_cast %27 : vector<16x128xf32> to vector<2x8x128xf32>
    %c0_26 = arith.constant 0 : index
    %c1_27 = arith.constant 1 : index
    %c0_28 = arith.constant 0 : index
    %29 = vector.load %arg12[%c0_26, %c1_27, %c0_28] : memref<2x10x256xf32, #tpu.memory_space<vmem>>, vector<2x8x128xf32>
    tpu.vector_store %arg12[%c0_26, %c1_27, %c0_28], %28 {strides = array<i32>} : memref<2x10x256xf32, #tpu.memory_space<vmem>>, vector<2x8x128xf32>,
    %c0_29 = arith.constant 0 : index
    %c0_30 = arith.constant 0 : index
    %c0_31 = arith.constant 0 : index
    %30 = vector.load %arg12[%c0_29, %c0_30, %c0_31] : memref<2x10x256xf32, #tpu.memory_space<vmem>>, vector<2x8x256xf32>
    %31 = vector.shape_cast %30 : vector<2x8x256xf32> to vector<16x256xf32>
    %c0_32 = arith.constant 0 : index
    %c1_33 = arith.constant 1 : index
    %c0_34 = arith.constant 0 : index
    %32 = vector.load %arg12[%c0_32, %c1_33, %c0_34] : memref<2x10x256xf32, #tpu.memory_space<vmem>>, vector<2x8x256xf32>
    %33 = vector.shape_cast %32 : vector<2x8x256xf32> to vector<16x256xf32>
    %c0_35 = arith.constant 0 : index
    %c2_36 = arith.constant 2 : index
    %c0_37 = arith.constant 0 : index
    %34 = vector.load %arg12[%c0_35, %c2_36, %c0_37] : memref<2x10x256xf32, #tpu.memory_space<vmem>>, vector<2x8x256xf32>
    %35 = vector.shape_cast %34 : vector<2x8x256xf32> to vector<16x256xf32>
    %36 = tpu.concatenate %31, %33, %35 in 1 : vector<16x256xf32>, vector<16x256xf32>, vector<16x256xf32> -> vector<16x768xf32>
    %37 = arith.truncf %36 : vector<16x768xf32> to vector<16x768xbf16>
    %c0_38 = arith.constant 0 : index
    %c0_39 = arith.constant 0 : index
    %38 = vector.load %arg5[%c0_38, %c0_39] : memref<768x128xbf16, #tpu.memory_space<vmem>>, vector<768x128xbf16>
    %cst_40 = arith.constant dense<0.000000e+00> : vector<16x128xf32>
    %39 = tpu.matmul %37, %38, %cst_40 {dimension_numbers = #tpu.dot_dimension_numbers<[1], [0], [0], [1], [0, 0, 1, 1], [], []>} : vector<16x768xbf16>, vector<768x128xbf16>, vector<16x128xf32> -> vector<16x128xf32>
    %c0_41 = arith.constant 0 : index
    %c0_42 = arith.constant 0 : index
    %40 = vector.load %arg6[%c0_41, %c0_42] : memref<1x128xf32, #tpu.memory_space<vmem>>, vector<1x128xf32>
    %41 = vector.broadcast %40 : vector<1x128xf32> to vector<16x128xf32>
    %42 = arith.addf %39, %41 : vector<16x128xf32>
    %cst_43 = arith.constant 0.000000e+00 : f32
    %43 = vector.broadcast %cst_43 : f32 to vector<16x128xf32>
    %44 = arith.maximumf %42, %43 : vector<16x128xf32>
    %45 = arith.truncf %44 : vector<16x128xf32> to vector<16x128xbf16>
    %c0_44 = arith.constant 0 : index
    %c0_45 = arith.constant 0 : index
    %46 = vector.load %arg7[%c0_44, %c0_45] : memref<128x512xbf16, #tpu.memory_space<vmem>>, vector<128x512xbf16>
    %cst_46 = arith.constant dense<0.000000e+00> : vector<16x512xf32>
    %47 = tpu.matmul %45, %46, %cst_46 {dimension_numbers = #tpu.dot_dimension_numbers<[1], [0], [0], [1], [0, 0, 1, 1], [], []>} : vector<16x128xbf16>, vector<128x512xbf16>, vector<16x512xf32> -> vector<16x512xf32>
    %c0_47 = arith.constant 0 : index
    %c0_48 = arith.constant 0 : index
    %48 = vector.load %arg8[%c0_47, %c0_48] : memref<1x512xf32, #tpu.memory_space<vmem>>, vector<1x512xf32>
    %49 = vector.broadcast %48 : vector<1x512xf32> to vector<16x512xf32>
    %50 = arith.addf %47, %49 : vector<16x512xf32>
    %cst_49 = arith.constant 0.000000e+00 : f32
    %51 = vector.broadcast %cst_49 : f32 to vector<16x512xf32>
    %52 = arith.maximumf %50, %51 : vector<16x512xf32>
    %cst_50 = arith.constant 0.000000e+00 : f32
    %53 = vector.broadcast %cst_50 : f32 to vector<2x18x384xf32>
    %c0_51 = arith.constant 0 : index
    %c0_52 = arith.constant 0 : index
    %c0_53 = arith.constant 0 : index
    %54 = vector.load %arg13[%c0_51, %c0_52, %c0_53] : memref<2x18x384xf32, #tpu.memory_space<vmem>>, vector<2x18x384xf32>
    tpu.vector_store %arg13[%c0_51, %c0_52, %c0_53], %53 {strides = array<i32>} : memref<2x18x384xf32, #tpu.memory_space<vmem>>, vector<2x18x384xf32>,
    %55 = vector.shape_cast %52 : vector<16x512xf32> to vector<2x16x256xf32>
    %c0_54 = arith.constant 0 : index
    %c1_55 = arith.constant 1 : index
    %c0_56 = arith.constant 0 : index
    %56 = vector.load %arg13[%c0_54, %c1_55, %c0_56] : memref<2x18x384xf32, #tpu.memory_space<vmem>>, vector<2x16x256xf32>
    tpu.vector_store %arg13[%c0_54, %c1_55, %c0_56], %55 {strides = array<i32>} : memref<2x18x384xf32, #tpu.memory_space<vmem>>, vector<2x16x256xf32>,
    %c0_57 = arith.constant 0 : index
    %c0_58 = arith.constant 0 : index
    %c0_59 = arith.constant 0 : index
    %57 = vector.load %arg13[%c0_57, %c0_58, %c0_59] : memref<2x18x384xf32, #tpu.memory_space<vmem>>, vector<2x16x384xf32>
    %58 = vector.shape_cast %57 : vector<2x16x384xf32> to vector<32x384xf32>
    %c0_60 = arith.constant 0 : index
    %c1_61 = arith.constant 1 : index
    %c0_62 = arith.constant 0 : index
    %59 = vector.load %arg13[%c0_60, %c1_61, %c0_62] : memref<2x18x384xf32, #tpu.memory_space<vmem>>, vector<2x16x384xf32>
    %60 = vector.shape_cast %59 : vector<2x16x384xf32> to vector<32x384xf32>
    %c0_63 = arith.constant 0 : index
    %c2_64 = arith.constant 2 : index
    %c0_65 = arith.constant 0 : index
    %61 = vector.load %arg13[%c0_63, %c2_64, %c0_65] : memref<2x18x384xf32, #tpu.memory_space<vmem>>, vector<2x16x384xf32>
    %62 = vector.shape_cast %61 : vector<2x16x384xf32> to vector<32x384xf32>
    %63 = tpu.concatenate %58, %60, %62 in 1 : vector<32x384xf32>, vector<32x384xf32>, vector<32x384xf32> -> vector<32x1152xf32>
    %64 = arith.truncf %63 : vector<32x1152xf32> to vector<32x1152xbf16>
    %c0_66 = arith.constant 0 : index
    %c0_67 = arith.constant 0 : index
    %65 = vector.load %arg9[%c0_66, %c0_67] : memref<1152x64xbf16, #tpu.memory_space<vmem>>, vector<1152x64xbf16>
    %cst_68 = arith.constant dense<0.000000e+00> : vector<32x64xf32>
    %66 = tpu.matmul %64, %65, %cst_68 {dimension_numbers = #tpu.dot_dimension_numbers<[1], [0], [0], [1], [0, 0, 1, 1], [], []>} : vector<32x1152xbf16>, vector<1152x64xbf16>, vector<32x64xf32> -> vector<32x64xf32>
    %c0_69 = arith.constant 0 : index
    %c0_70 = arith.constant 0 : index
    %67 = vector.load %arg10[%c0_69, %c0_70] : memref<1x64xf32, #tpu.memory_space<vmem>>, vector<1x64xf32>
    %68 = vector.broadcast %67 : vector<1x64xf32> to vector<32x64xf32>
    %69 = arith.addf %66, %68 : vector<32x64xf32>
    %cst_71 = arith.constant 5.000000e-01 : f32
    %70 = vector.broadcast %cst_71 : f32 to vector<32x64xf32>
    %71 = arith.mulf %70, %69 : vector<32x64xf32>
    %72 = math.tanh %71 : vector<32x64xf32>
    %cst_72 = arith.constant 1.000000e+00 : f32
    %73 = vector.broadcast %cst_72 : f32 to vector<32x64xf32>
    %74 = arith.addf %72, %73 : vector<32x64xf32>
    %cst_73 = arith.constant 5.000000e-01 : f32
    %75 = vector.broadcast %cst_73 : f32 to vector<32x64xf32>
    %76 = arith.mulf %75, %74 : vector<32x64xf32>
    %c0_74 = arith.constant 0 : index
    %c0_75 = arith.constant 0 : index
    %77 = vector.load %arg11[%c0_74, %c0_75] : memref<32x64xf32, #tpu.memory_space<vmem>>, vector<32x64xf32>
    tpu.vector_store %arg11[%c0_74, %c0_75], %76 {strides = array<i32>} : memref<32x64xf32, #tpu.memory_space<vmem>>, vector<32x64xf32>,
    return
  }
}

</mosaic_0001>

<bundles_post_ra>
// kernel: liutkus_decoder_forward.1
= control target key start
LH: loop header
LB: loop body
LE: loop exit
PB: predicated region body
PF: predicated region fallthrough
CT: control target
= control target key end

     0   :  { %16 = vsyncpa [#allocation5], 0  ;;  %s4968_s0 = inlined_call_operand.vmem [shape: f32[2,32], index: 0, kind: input, shape index: {}]   ;;  %s4969_s1 = inlined_call_operand.vmem [shape: bf16[32,1024], index: 1, kind: input, shape index: {}]   ;;  %s4970_s2 = inlined_call_operand.hbm [shape: f32[1,1024], index: 2, kind: input, shape index: {}]   ;;  %s4971_s3 = inlined_call_operand.vmem [shape: bf16[768,128], index: 3, kind: input, shape index: {}]   ;;  %s4972_s4 = inlined_call_operand.hbm [shape: f32[1,128], index: 4, kind: input, shape index: {}]   ;;  %s4973_s5 = inlined_call_operand.vmem [shape: bf16[768,128], index: 5, kind: input, shape index: {}]   ;;  %s4974_s6 = inlined_call_operand.hbm [shape: f32[1,128], index: 6, kind: input, shape index: {}]   ;;  %s4975_s7 = inlined_call_operand.hbm [shape: bf16[128,512], index: 7, kind: input, shape index: {}]   ;;  %s4976_s8 = inlined_call_operand.hbm [shape: f32[1,512], index: 8, kind: input, shape index: {}]   ;;  %s4977_s9 = inlined_call_operand.vmem [shape: bf16[1152,64], index: 9, kind: input, shape index: {}]   ;;  %s4978_s10 = inlined_call_operand.hbm [shape: f32[1,64], index: 10, kind: input, shape index: {}]   ;;  %s4979_s11 = inlined_call_operand.vmem [shape: f32[32,64], index: 11, kind: output, shape index: {}]  }
   0x1   :  { %17 = vsyncpa [#allocation7], 0 }
   0x2   :  { %18 = vsyncpa [#allocation10], 0 }
   0x3   :  { %19 = vsyncpa [#allocation13], 0  ;;  %s4111_s17 = smov [#allocation6]   ;;  %s4112_s19 = smov [#allocation9]  }
   0x4   :  { %s42_s18 = sshll.u32 %s4111_s17, 4  ;;  %s63_s20 = sshll.u32 %s4112_s19, 4  ;;  %s43_s18 = int_to_ptr.vmem [resolvable:$true] %s42_s18  ;;  %s4185_s20 = int_to_ptr.vmem [resolvable:$true] %s63_s20 }
   0x5   :  { %s3971_s23 = scalar_lea.hbm %s4972_s4, 16 }
   0x6   :  { %p3972_p0 = scmp.ne.s32.totalorder %s4972_s4, %s3971_s23  ;;  %p3975_p1 = scmp.lt.u32.totalorder %s3971_s23, %s4972_s4 }
   0x8   :  { %p3977_p2 = pnand %p3975_p1, %p3972_p0 }
   0xa   :  { %3980 = shalt.err (!%p3977_p2)
}
   0xb   :  { %s3981_s28 = scalar_lea.vmem %s43_s18, 16  ;;  %s3985_s29 = scalar_lea.vmem %s43_s18, 32 }
   0xc   :  { %p3982_p3 = scmp.ne.s32.totalorder %s43_s18, %s3981_s28  ;;  %p3986_p4 = scmp.lt.s32.totalorder %s43_s18, %s43_s18 }
   0xd   :  { %p3987_p5 = scmp.lt.s32.totalorder %s3985_s29, %s3981_s28 }
   0xf   :  { %p3988_p6 = por %p3987_p5, %p3986_p4 }
  0x11   :  { %p3989_p7 = pnand %p3988_p6, %p3982_p3 }
  0x13   :  { %3992 = shalt.err (!%p3989_p7)
}
  0x14   :  { %45 = dma.hbm_to_vmem [thread:$0]  %s4972_s4, 16, %s43_s18, [#allocation7]  }
  0x15   :  { %s3993_s15 = scalar_lea.hbm %s4975_s7, 4096 }
  0x16   :  { %p3994_p8 = scmp.ne.s32.totalorder %s4975_s7, %s3993_s15  ;;  %p3997_p9 = scmp.lt.u32.totalorder %s3993_s15, %s4975_s7 }
  0x18   :  { %p3999_p10 = pnand %p3997_p9, %p3994_p8 }
  0x1a   :  { %4002 = shalt.err (!%p3999_p10)
}
  0x1b   :  { %s4003_s22 = scalar_lea.vmem %s4185_s20, 4096  ;;  %p4008_p12 = scmp.lt.s32.totalorder %s4185_s20, %s4185_s20 }
  0x1c   :  { %p4004_p11 = scmp.ne.s32.totalorder %s4185_s20, %s4003_s22  ;;  %p4009_p13 = scmp.lt.s32.totalorder %s4003_s22, %s4003_s22 }
  0x1e   :  { %p4010_p0 = por %p4009_p13, %p4008_p12 }
  0x20   :  { %p4011_p1 = pnand %p4010_p0, %p4004_p11 }
  0x22   :  { %4014 = shalt.err (!%p4011_p1)
}
  0x23   :  { %s4113_s4 = smov 256   ;;  %s4114_s18 = smov 16  }
  0x24   :  { %69 = dma.hbm_to_vmem [thread:$0]  %s4975_s7, 4096, %s4185_s20, [#allocation10], %s4113_s4, %s4113_s4, %s4114_s18  }
  0x25   :  { %s4115_s25 = smov [#allocation4]   ;;  %s4116_s27 = smov [#allocation8]  }
  0x26   :  { %s30_s26 = sshll.u32 %s4115_s25, 4  ;;  %s54_s28 = sshll.u32 %s4116_s27, 4  ;;  %s31_s26 = int_to_ptr.vmem [resolvable:$true] %s30_s26  ;;  %s55_s28 = int_to_ptr.vmem [resolvable:$true] %s54_s28 }
  0x27   :  { %s4015_s12 = scalar_lea.hbm %s4970_s2, 128 }
  0x28   :  { %p4016_p2 = scmp.ne.s32.totalorder %s4970_s2, %s4015_s12  ;;  %p4019_p3 = scmp.lt.u32.totalorder %s4015_s12, %s4970_s2 }
  0x2a   :  { %p4021_p4 = pnand %p4019_p3, %p4016_p2 }
  0x2c   :  { %4024 = shalt.err (!%p4021_p4)
}
  0x2d   :  { %s4025_s7 = scalar_lea.vmem %s31_s26, 128  ;;  %p4030_p6 = scmp.lt.s32.totalorder %s31_s26, %s31_s26 }
  0x2e   :  { %p4026_p5 = scmp.ne.s32.totalorder %s31_s26, %s4025_s7  ;;  %p4031_p7 = scmp.lt.s32.totalorder %s4025_s7, %s4025_s7 }
  0x30   :  { %p4032_p8 = por %p4031_p7, %p4030_p6 }
  0x32   :  { %p4033_p9 = pnand %p4032_p8, %p4026_p5 }
  0x34   :  { %4036 = shalt.err (!%p4033_p9)
}
  0x35   :  { %33 = dma.hbm_to_vmem [thread:$0]  %s4970_s2, 128, %s31_s26, [#allocation5]  }
  0x36   :  { %s4037_s22 = scalar_lea.hbm %s4974_s6, 16 }
  0x37   :  { %p4038_p10 = scmp.ne.s32.totalorder %s4974_s6, %s4037_s22  ;;  %p4041_p11 = scmp.lt.u32.totalorder %s4037_s22, %s4974_s6 }
  0x39   :  { %p4043_p12 = pnand %p4041_p11, %p4038_p10 }
  0x3b   :  { %4046 = shalt.err (!%p4043_p12)
}
  0x3c   :  { %s4047_s25 = scalar_lea.vmem %s55_s28, 16  ;;  %s4051_s27 = scalar_lea.vmem %s55_s28, 32 }
  0x3d   :  { %p4048_p13 = scmp.ne.s32.totalorder %s55_s28, %s4047_s25  ;;  %p4052_p0 = scmp.lt.s32.totalorder %s55_s28, %s55_s28 }
  0x3e   :  { %p4053_p1 = scmp.lt.s32.totalorder %s4051_s27, %s4047_s25 }
  0x40   :  { %p4054_p2 = por %p4053_p1, %p4052_p0 }
  0x42   :  { %p4055_p3 = pnand %p4054_p2, %p4048_p13 }
  0x44   :  { %4058 = shalt.err (!%p4055_p3)
}
  0x45   :  { %57 = dma.hbm_to_vmem [thread:$0]  %s4974_s6, 16, %s55_s28, [#allocation7]  }
  0x46   :  { %s4117_s29 = smov [#allocation11]   ;;  %s4118_s12 = smov [#allocation12]  }
  0x47   :  { %s76_s30 = sshll.u32 %s4117_s29, 4  ;;  %s88_s13 = sshll.u32 %s4118_s12, 4  ;;  %s77_s30 = int_to_ptr.vmem [resolvable:$true] %s76_s30  ;;  %s89_s13 = int_to_ptr.vmem [resolvable:$true] %s88_s13 }
  0x48   :  { %s4059_s16 = scalar_lea.hbm %s4976_s8, 64 }
  0x49   :  { %p4060_p4 = scmp.ne.s32.totalorder %s4976_s8, %s4059_s16  ;;  %p4063_p5 = scmp.lt.u32.totalorder %s4059_s16, %s4976_s8 }
  0x4b   :  { %p4065_p6 = pnand %p4063_p5, %p4060_p4 }
  0x4d   :  { %4068 = shalt.err (!%p4065_p6)
}
  0x4e   :  { %s4069_s6 = scalar_lea.vmem %s77_s30, 64  ;;  %p4074_p8 = scmp.lt.s32.totalorder %s77_s30, %s77_s30 }
  0x4f   :  { %p4070_p7 = scmp.ne.s32.totalorder %s77_s30, %s4069_s6  ;;  %p4075_p9 = scmp.lt.s32.totalorder %s4069_s6, %s4069_s6 }
  0x51   :  { %p4076_p10 = por %p4075_p9, %p4074_p8 }
  0x53   :  { %p4077_p11 = pnand %p4076_p10, %p4070_p7 }
  0x55   :  { %4080 = shalt.err (!%p4077_p11)
}
  0x56   :  { %79 = dma.hbm_to_vmem [thread:$0]  %s4976_s8, 64, %s77_s30, [#allocation10]  }
  0x57   :  { %s4081_s18 = scalar_lea.hbm %s4978_s10, 16 }
  0x58   :  { %p4082_p12 = scmp.ne.s32.totalorder %s4978_s10, %s4081_s18  ;;  %p4085_p13 = scmp.lt.u32.totalorder %s4081_s18, %s4978_s10 }
  0x5a   :  { %p4087_p0 = pnand %p4085_p13, %p4082_p12 }
  0x5c   :  { %4090 = shalt.err (!%p4087_p0)
}
  0x5d   :  { %s4091_s2 = scalar_lea.vmem %s89_s13, 16  ;;  %s4095_s26 = scalar_lea.vmem %s89_s13, 32 }
  0x5e   :  { %p4092_p1 = scmp.ne.s32.totalorder %s89_s13, %s4091_s2  ;;  %p4096_p2 = scmp.lt.s32.totalorder %s89_s13, %s89_s13 }
  0x5f   :  { %p4097_p3 = scmp.lt.s32.totalorder %s4095_s26, %s4091_s2 }
  0x61   :  { %p4098_p4 = por %p4097_p3, %p4096_p2 }
  0x63   :  { %p4099_p5 = pnand %p4098_p4, %p4092_p1 }
  0x65   :  { %4102 = shalt.err (!%p4099_p5)
}
  0x66   :  { %91 = dma.hbm_to_vmem [thread:$0]  %s4978_s10, 16, %s89_s13, [#allocation13]  }
  0x67   :  { %4103 = dma.done.wait [#allocation5], 128  }
  0x68   :  { %4104 = vsyncadd [#allocation5], 4294967168 }
  0x69   :  { %4105 = dma.done.wait [#allocation7], 32  }
  0x6a   :  { %4106 = vsyncadd [#allocation7], 4294967264 }
  0x6b   :  { %4107 = dma.done.wait [#allocation10], 4160  }
  0x6c   :  { %4108 = vsyncadd [#allocation10], 4294963136 }
  0x6d   :  { %4109 = dma.done.wait [#allocation13], 16  }
  0x6e   :  { %4110 = vsyncadd [#allocation13], 4294967280  ;;  %v4119_v0 = vmov 0   ;;  %v113_v1 = vld [vmem:[%s4969_s1] sm:$0xff]  ;;  %v114_v8 = vld [vmem:[%s4969_s1 + $0x8] sm:$0xff]  ;;  %vm251_vm0 = vcmask 261120  }
  0x6f   :  { %287 = vmatprep.mubr.bf16.mxu1 %v4119_v0  ;;  %369 = vmatprep.mubr.bf16.mxu0 %v4119_v0  ;;  %v117_v2 = vld [vmem:[%s4969_s1 + $0x20] sm:$0xff]  ;;  %v118_v9 = vld [vmem:[%s4969_s1 + $0x28] sm:$0xff]  ;;  %v115_v10 = vld [vmem:[%s4969_s1 + $0x10] sm:$0xff]  ;;  %v4120_v49 = vmov 0.0   ;;  %vm515_vm1 = vcmask 1046528   ;;  %vm548_vm2 = vcmask 1045504  }
  0x70   :  { %v121_v3 = vld [vmem:[%s4969_s1 + $0x40] sm:$0xff]  ;;  %v3237_v4 = vcombine.high %v113_v1, %v117_v2  ;;  %v3236_v5 = vcombine.low %v113_v1, %v117_v2  ;;  %v119_v11 = vld [vmem:[%s4969_s1 + $0x30] sm:$0xff]  ;;  %v3239_v18 = vcombine.high %v114_v8, %v118_v9  ;;  %v122_v19 = vld [vmem:[%s4969_s1 + $0x48] sm:$0xff]  ;;  %v3238_v24 = vcombine.low %v114_v8, %v118_v9  ;;  %427 = vst [vmem:[#allocation2] sm:$0xff] %v4120_v49 }
  0x71   :  { %v125_v6 = vld [vmem:[%s4969_s1 + $0x60] sm:$0xff]  ;;  %v3241_v14 = vcombine.high %v115_v10, %v119_v11  ;;  %v3240_v15 = vcombine.low %v115_v10, %v119_v11  ;;  %v123_v16 = vld [vmem:[%s4969_s1 + $0x50] sm:$0xff]  ;;  %v126_v20 = vld [vmem:[%s4969_s1 + $0x68] sm:$0xff]  ;;  %429 = vst [vmem:[#allocation2 + $0x10] sm:$0x3] %v4120_v49  ;;  %vm2174_vm3 = vcmask 1040384  }
  0x72   :  { %v3245_v7 = vcombine.high %v121_v3, %v125_v6  ;;  %255 = vmatprep.subr.bf16.mxu1 %v3237_v4  ;;  %v3244_v12 = vcombine.low %v121_v3, %v125_v6  ;;  %v111_v13 = vld [vmem:[%s4968_s0] sm:$0x3]  ;;  %v127_v17 = vld [vmem:[%s4969_s1 + $0x70] sm:$0xff]  ;;  %v116_v25 = vld [vmem:[%s4969_s1 + $0x18] sm:$0xff]  ;;  %v3247_v27 = vcombine.high %v122_v19, %v126_v20  ;;  %v3246_v28 = vcombine.low %v122_v19, %v126_v20 }
  0x73   :  { %256 = vmatpush1.bf16.msra.mxu1 %v3236_v5  ;;  %v3249_v21 = vcombine.high %v123_v16, %v127_v17  ;;  %337 = vmatprep.subr.bf16.mxu0 %v3241_v14  ;;  %v112_v22 = vpack.c.bf16 %v111_v13, %v111_v13  ;;  %v3248_v23 = vcombine.low %v123_v16, %v127_v17  ;;  %v120_v26 = vld [vmem:[%s4969_s1 + $0x38] sm:$0xff]  ;;  %v3746_v35 = vld [vmem:[%s4971_s3 + $0x40] sm:$0xff]   ;;  %v3748_v37 = vld [vmem:[%s4971_s3 + $0x48] sm:$0xff]   ;;  %v4121_v5 = vmov 0.0|0.0  }
  0x74   :  { %257 = vmatprep.subr.bf16.mxu1 %v3245_v7  ;;  %338 = vmatpush1.bf16.msra.mxu0 %v3240_v15  ;;  %v124_v29 = vld [vmem:[%s4969_s1 + $0x58] sm:$0xff]  ;;  %v3243_v31 = vcombine.high %v116_v25, %v120_v26  ;;  %v3242_v32 = vcombine.low %v116_v25, %v120_v26  ;;  %v3747_v36 = vld [vmem:[%s4971_s3] sm:$0xff]   ;;  %v3750_v39 = vld [vmem:[%s4971_s3 + $0x8] sm:$0xff]   ;;  %431 = vst [vmem:[#allocation2 + $0x20] sm:$0xff] %v4120_v49  ;;  %vm3223_vm4 = vcmask 523264  }
  0x75   :  { %339 = vmatprep.subr.bf16.mxu0 %v3249_v21  ;;  %v128_v30 = vld [vmem:[%s4969_s1 + $0x78] sm:$0xff]  ;;  %v3749_v38 = vld [vmem:[%s4971_s3 + $0xc0] sm:$0xff]   ;;  %v3752_v41 = vld [vmem:[%s4971_s3 + $0x50] sm:$0xff]   ;;  %433 = vst [vmem:[#allocation2 + $0x30] sm:$0x3] %v4120_v49 }
  0x76   :  { %v3251_v33 = vcombine.high %v124_v29, %v128_v30  ;;  %v3250_v34 = vcombine.low %v124_v29, %v128_v30  ;;  %v3751_v40 = vld [vmem:[%s4971_s3 + $0x80] sm:$0xff]   ;;  %v3753_v42 = vld [vmem:[%s4971_s3 + $0xc8] sm:$0xff]   ;;  %v3754_v43 = vld [vmem:[%s4971_s3 + $0x10] sm:$0xff]   ;;  %428 = vst [vmem:[#allocation2 + $0x8] sm:$0xff] %v4120_v49  ;;  %v4122_v30 = vmov 1983009808  }
  0x77   :  { %258 = vmatpush1.bf16.msra.mxu1 %v3244_v12  ;;  %v3755_v44 = vld [vmem:[%s4971_s3 + $0x88] sm:$0xff]   ;;  %v3756_v45 = vld [vmem:[%s4971_s3 + $0x58] sm:$0xff]   ;;  %v3757_v46 = vld [vmem:[%s4971_s3 + $0xd0] sm:$0xff]   ;;  %430 = vst [vmem:[#allocation2 + $0x18] sm:$0x3] %v4120_v49 }
  0x78   :  { %296 = vmatprep.subr.bf16.mxu1 %v3239_v18  ;;  %340 = vmatpush1.bf16.msra.mxu0 %v3248_v23  ;;  %v3758_v47 = vld [vmem:[%s4971_s3 + $0x18] sm:$0xff]   ;;  %v3759_v48 = vld [vmem:[%s4971_s3 + $0x90] sm:$0xff]   ;;  %432 = vst [vmem:[#allocation2 + $0x28] sm:$0xff] %v4120_v49  ;;  %434 = vst [vmem:[#allocation2 + $0x38] sm:$0x3] %v4120_v49  ;;  %v131_v18 = vlaneseq }
  0x79   :  { %3459 = vmatprep.subr.bf16.mxu0 %v3746_v35  ;;  %1996 = vst [vmem:[#allocation3] sm:$0xff] %v4120_v49  ;;  %1997 = vst [vmem:[#allocation3 + $0x8] sm:$0xff] %v4120_v49  ;;  %v3760_v50 = vld [vmem:[%s4971_s3 + $0x60] sm:$0xff]   ;;  %v3761_v51 = vld [vmem:[%s4971_s3 + $0xd8] sm:$0xff]  }
  0x7a   :  { %3252 = vmatmul.mubr.msk.bf16.vlgmr.msra.gmra.mrb[0].mxu1 %vm251_vm0, %v112_v22  ;;  %1998 = vst [vmem:[#allocation3 + $0x10] sm:$0xff] %v4120_v49  ;;  %2002 = vst [vmem:[#allocation3 + $0x30] sm:$0x3] %v4120_v49  ;;  %v3762_v52 = vld [vmem:[%s4971_s3 + $0x20] sm:$0xff]   ;;  %v3763_v53 = vld [vmem:[%s4971_s3 + $0x98] sm:$0xff]   ;;  %v4425_v19 = vshrl.u32 %v131_v18, 7 }
  0x7b   :  { %297 = vmatpush1.bf16.msra.mxu1 %v3238_v24  ;;  %328 = vmatprep.mubr.bf16.mxu1 %v4119_v0  ;;  %2003 = vst [vmem:[#allocation3 + $0x38] sm:$0x3] %v4120_v49  ;;  %2004 = vst [vmem:[#allocation3 + $0x40] sm:$0x3] %v4120_v49  ;;  %v3764_v54 = vld [vmem:[%s4971_s3 + $0x68] sm:$0xff]   ;;  %v3765_v55 = vld [vmem:[%s4971_s3 + $0xe0] sm:$0xff]  }
  0x7c   :  { %298 = vmatprep.subr.bf16.mxu1 %v3247_v27  ;;  %3254 = vmatmul.mubr.msk.bf16.vlgmr.msra.gmra.mrb[0].mxu0 %vm251_vm0, %v112_v22  ;;  %2005 = vst [vmem:[#allocation3 + $0x48] sm:$0xff] %v4120_v49  ;;  %2006 = vst [vmem:[#allocation3 + $0x50] sm:$0xff] %v4120_v49  ;;  %v3766_v56 = vld [vmem:[%s4971_s3 + $0x28] sm:$0xff]   ;;  %v3767_v57 = vld [vmem:[%s4971_s3 + $0xa0] sm:$0xff]   ;;  %v133_v20 = vsub.s32 0, %v4425_v19  ;;  %v137_v23 = vsub.s32 1, %v4425_v19 }
  0x7d   :  { %3460 = vmatpush3.bf16.msra.mxu0 %v3747_v36  ;;  %2007 = vst [vmem:[#allocation3 + $0x58] sm:$0xff] %v4120_v49  ;;  %2011 = vst [vmem:[#allocation3 + $0x78] sm:$0x3] %v4120_v49  ;;  %v3768_v58 = vld [vmem:[%s4971_s3 + $0x70] sm:$0xff]   ;;  %v3769_v59 = vld [vmem:[%s4971_s3 + $0xe8] sm:$0xff]   ;;  %994 = vmatprep.mubr.bf16.mxu0 %v4121_v5  ;;  %v141_v25 = vsub.s32 2, %v4425_v19 }
  0x7e   :  { %3461 = vmatprep.subr.bf16.mxu0 %v3748_v37  ;;  %2012 = vst [vmem:[#allocation3 + $0x80] sm:$0x3] %v4120_v49  ;;  %2013 = vst [vmem:[#allocation3 + $0x88] sm:$0x3] %v4120_v49  ;;  %v3770_v60 = vld [vmem:[%s4971_s3 + $0x30] sm:$0xff]   ;;  %v3771_v61 = vld [vmem:[%s4971_s3 + $0xa8] sm:$0xff]  }
  0x7f   :  { %299 = vmatpush1.bf16.msra.mxu1 %v3246_v28  ;;  %v3772_v62 = vld [vmem:[%s4971_s3 + $0x78] sm:$0xff]   ;;  %v3773_v63 = vld [vmem:[%s4971_s3 + $0xf0] sm:$0xff]   ;;  %v3777_v4 = vld [vmem:[%s4971_s3 + $0x140] sm:$0xff]   ;;  %v145_v27 = vsub.s32 3, %v4425_v19  ;;  %v149_v36 = vsub.s32 4, %v4425_v19 }
  0x80   :  { %378 = vmatprep.subr.bf16.mxu1 %v3243_v31  ;;  %v3774_v1 = vld [vmem:[%s4971_s3 + $0x38] sm:$0xff]   ;;  %v3775_v2 = vld [vmem:[%s4971_s3 + $0xb0] sm:$0xff]   ;;  %v500_v6 = vld [vmem:[#allocation2 + $0x8] sm:$0xfe]  ;;  %v437_v31 = vunpack.c.l.s4 %v4122_v30 }
  0x81   :  { %3462 = vmatpush3.bf16.msra.mxu0 %v3750_v39  ;;  %v3776_v3 = vld [vmem:[%s4971_s3 + $0xf8] sm:$0xff]   ;;  %v504_v8 = vld [vmem:[#allocation2 + $0x28] sm:$0xfe]  ;;  %v519_v11 = vrot.slane %v500_v6, 1  ;;  %v129_v21 = vld [vmem:[#allocation4] sm:$0xff]  ;;  %v153_v39 = vsub.s32 5, %v4425_v19 }
  0x82   :  { %3253 = vmatmul.mubr.msk.bf16.vlgmr.msra.gmra.mrb[4].mxu1 %vm251_vm0, %v112_v22  ;;  %3463 = vmatprep.subr.bf16.mxu0 %v3752_v41  ;;  %v502_v7 = vld [vmem:[#allocation2 + $0x18] sm:$0x1]  ;;  %v525_v13 = vrot.slane %v504_v8, 1  ;;  %v134_v28 = vrot.slane %v129_v21, %v133_v20  ;;  %v142_v35 = vrot.slane %v129_v21, %v141_v25 }
  0x83   :  { %379 = vmatpush1.bf16.msra.mxu1 %v3242_v32  ;;  %410 = vmatprep.mubr.bf16.mxu1 %v4119_v0  ;;  %v3778_v9 = vld [vmem:[%s4971_s3 + $0xb8] sm:$0xff]   ;;  %v520_v12 = vrot.slane %v502_v7, 1 }
  0x84   :  { %380 = vmatprep.subr.bf16.mxu1 %v3251_v33  ;;  %v506_v10 = vld [vmem:[#allocation2 + $0x38] sm:$0x1]  ;;  %v138_v33 = vrot.slane %v129_v21, %v137_v23 }
  0x85   :  { %3464 = vmatpush3.bf16.msra.mxu0 %v3754_v43  ;;  %v526_v14 = vrot.slane %v506_v10, 1  ;;  %v521_v15 = vsel %vm515_vm1, %v519_v11, %v520_v12 }
  0x86   :  { %3465 = vmatprep.subr.bf16.mxu0 %v3756_v45 }
  0x87   :  { %381 = vmatpush1.bf16.msra.mxu1 %v3250_v34  ;;  %v527_v16 = vsel %vm515_vm1, %v525_v13, %v526_v14 }
  0x88   :  { %3481 = vmatprep.subr.bf16.mxu1 %v3749_v38  ;;  %v568_v17 = vpack.c.bf16 %v527_v16, %v521_v15  ;;  %v146_v38 = vrot.slane %v129_v21, %v145_v27 }
  0x89   :  { %3466 = vmatpush3.bf16.msra.mxu0 %v3758_v47  ;;  %v150_v47 = vrot.slane %v129_v21, %v149_v36  ;;  %v537_v36 = vld [vmem:[#allocation2 + $0x28] sm:$0xfc] }
  0x8a   :  { %3255 = vmatmul.mubr.msk.bf16.vlgmr.msra.gmra.mrb[8].mxu1 %vm251_vm0, %v112_v22  ;;  %3467 = vmatprep.subr.bf16.mxu0 %v3760_v50 }
  0x8b   :  { %3482 = vmatpush3.bf16.msra.mxu1 %v3751_v40  ;;  %1035 = vmatprep.mubr.bf16.mxu1 %v568_v17 }
  0x8c   :  { %3483 = vmatprep.subr.bf16.mxu1 %v3753_v42  ;;  %v438_v42 = vunpack.c.0.s8 %v437_v31 }
  0x8d   :  { %3468 = vmatpush3.bf16.msra.mxu0 %v3762_v52  ;;  %v161_v52 = vsub.s32 7, %v4425_v19 }
  0x8e   :  { %3469 = vmatprep.subr.bf16.mxu0 %v3764_v54 }
  0x8f   :  { %3484 = vmatpush3.bf16.msra.mxu1 %v3755_v44 }
  0x90   :  { %3485 = vmatprep.subr.bf16.mxu1 %v3757_v46 }
  0x91   :  { %3470 = vmatpush3.bf16.msra.mxu0 %v3766_v56 }
  0x92   :  { %3471 = vmatprep.subr.bf16.mxu0 %v3768_v58 }
  0x93   :  { %3486 = vmatpush3.bf16.msra.mxu1 %v3759_v48  ;;  %v157_v48 = vsub.s32 6, %v4425_v19 }
  0x94   :  { %3487 = vmatprep.subr.bf16.mxu1 %v3761_v51  ;;  %v154_v51 = vrot.slane %v129_v21, %v153_v39 }
  0x95   :  { %3472 = vmatpush3.bf16.msra.mxu0 %v3770_v60 }
  0x96   :  { %3473 = vmatprep.subr.bf16.mxu0 %v3772_v62 }
  0x97   :  { %3488 = vmatpush3.bf16.msra.mxu1 %v3763_v53 }
  0x98   :  { %3489 = vmatprep.subr.bf16.mxu1 %v3765_v55  ;;  %v4444_v55 = vsub.s32 %v438_v42, %v4425_v19  ;;  %v558_v42 = vrot.slane %v537_v36, 2  ;;  %v3798_v36 = vld [vmem:[%s4973_s5 + $0x8] sm:$0xff]  }
  0x99   :  { %3474 = vmatpush3.bf16.msra.mxu0 %v3774_v1  ;;  %v162_v1 = vrot.slane %v129_v21, %v161_v52 }
  0x9a   :  { %3503 = vmatprep.subr.bf16.mxu0 %v3777_v4  ;;  %v4123_v4 = vmov 1934713408  }
  0x9b   :  { %3490 = vmatpush3.bf16.msra.mxu1 %v3767_v57  ;;  %v469_v6 = vunpack.c.l.s4 %v4123_v4  ;;  %v3784_v4 = vld [vmem:[%s4971_s3 + $0x158] sm:$0xff]  }
  0x9c   :  { %3491 = vmatprep.subr.bf16.mxu1 %v3769_v59 }
  0x9d   :  { %v470_v17 = vunpack.c.0.s8 %v469_v6  ;;  %v3785_v6 = vld [vmem:[%s4971_s3 + $0x118] sm:$0xff]  }
  0x9f   :  { %3492 = vmatpush3.bf16.msra.mxu1 %v3771_v61  ;;  %v158_v61 = vrot.slane %v129_v21, %v157_v48 }
  0xa0   :  { %3493 = vmatprep.subr.bf16.mxu1 %v3773_v63 }
  0xa3   :  { %3494 = vmatpush3.bf16.msra.mxu1 %v3775_v2 }
  0xa4   :  { %3495 = vmatprep.subr.bf16.mxu1 %v3776_v3 }
  0xa7   :  { %3496 = vmatpush3.bf16.msra.mxu1 %v3778_v9 }
 0x14d   :  { %v289_v22 = vpop.f32.mrb[0].mxu1 }
 0x14e   :  { %v291_v24 = vpop.f32.mrb[1].mxu1  ;;  %v290_v41 = vadd.f32 %v289_v22, %v134_v28 }
 0x14f   :  { %v293_v26 = vpop.f32.mrb[2].mxu1  ;;  %v371_v32 = vpop.f32.mrb[0].mxu0  ;;  %v292_v43 = vadd.f32 %v291_v24, %v138_v33 }
 0x150   :  { %v294_v29 = vpop.f32.mrb[3].mxu1  ;;  %v373_v34 = vpop.f32.mrb[1].mxu0  ;;  %v419_v53 = vmax.f32 %v290_v41, 0.0  ;;  %v372_v60 = vadd.f32 %v371_v32, %v150_v47  ;;  %v473_v26 = vsub.s32 %v470_v17, %v4425_v19  ;;  %v3780_v47 = vld [vmem:[%s4971_s3 + $0x148] sm:$0xff]  }
 0x151   :  { %v375_v37 = vpop.f32.mrb[2].mxu0  ;;  %v420_v57 = vmax.f32 %v292_v43, 0.0  ;;  %v374_v63 = vadd.f32 %v373_v34, %v154_v51  ;;  %v533_v34 = vld [vmem:[#allocation2 + $0x8] sm:$0xfc] }
 0x152   :  { %v376_v40 = vpop.f32.mrb[3].mxu0  ;;  %v423_v8 = vmax.f32 %v372_v60, 0.0  ;;  %v539_v37 = vld [vmem:[#allocation2 + $0x38] sm:$0x3] }
 0x153   :  { %v424_v12 = vmax.f32 %v374_v63, 0.0  ;;  %v552_v40 = vrot.slane %v533_v34, 2  ;;  %v559_v43 = vrot.slane %v539_v37, 2  ;;  %v3781_v63 = vld [vmem:[%s4971_s3 + $0x108] sm:$0xff]   ;;  %v3799_v34 = vld [vmem:[%s4973_s5 + $0x80] sm:$0xff]   ;;  %v3800_v37 = vld [vmem:[%s4973_s5 + $0x50] sm:$0xff]  }
 0x155   :  { %v330_v44 = vpop.f32.mrb[4].mxu1 }
 0x156   :  { %v331_v45 = vadd.f32 %v330_v44, %v142_v35  ;;  %v332_v46 = vpop.f32.mrb[5].mxu1  ;;  %v535_v35 = vld [vmem:[#allocation2 + $0x18] sm:$0x3] }
 0x157   :  { %v333_v49 = vadd.f32 %v332_v46, %v146_v38  ;;  %v334_v50 = vpop.f32.mrb[6].mxu1  ;;  %v553_v41 = vrot.slane %v535_v35, 2  ;;  %v3779_v46 = vld [vmem:[%s4971_s3 + $0x100] sm:$0xff]   ;;  %v3801_v35 = vld [vmem:[%s4973_s5 + $0xc8] sm:$0xff]  }
 0x158   :  { %v421_v54 = vmax.f32 %v331_v45, 0.0  ;;  %v335_v56 = vpop.f32.mrb[7].mxu1  ;;  %v560_v45 = vsel %vm548_vm2, %v558_v42, %v559_v43  ;;  %v3806_v42 = vld [vmem:[%s4973_s5 + $0x18] sm:$0xff]   ;;  %v3807_v43 = vld [vmem:[%s4973_s5 + $0x90] sm:$0xff]  }
 0x159   :  { %v422_v58 = vmax.f32 %v333_v49, 0.0  ;;  %v554_v44 = vsel %vm548_vm2, %v552_v40, %v553_v41  ;;  %v3804_v40 = vld [vmem:[%s4973_s5 + $0x58] sm:$0xff]   ;;  %v3805_v41 = vld [vmem:[%s4973_s5 + $0xd0] sm:$0xff]  }
 0x15a   :  { %v435_v59 = vcombine.low %v419_v53, %v421_v54  ;;  %v570_v51 = vpack.c.bf16 %v560_v45, %v554_v44  ;;  %v3808_v44 = vld [vmem:[%s4973_s5 + $0x60] sm:$0xff]   ;;  %v3809_v45 = vld [vmem:[%s4973_s5 + $0xd8] sm:$0xff]  }
 0x15b   :  { %v443_v62 = vcombine.low %v420_v57, %v422_v58 }
 0x15c   :  { %v442_v2 = vrot.slane %v435_v59, %v4444_v55 }
 0x15d   :  { %v450_v3 = vrot.slane %v443_v62, %v4444_v55  ;;  %v412_v7 = vpop.f32.mrb[8].mxu1 }
 0x15e   :  { %v413_v9 = vadd.f32 %v412_v7, %v158_v61  ;;  %v414_v10 = vpop.f32.mrb[9].mxu1  ;;  %v3786_v7 = vld [vmem:[%s4971_s3 + $0x160] sm:$0xff]  }
 0x15f   :  { %v467_v11 = vcombine.low %v442_v2, %v450_v3  ;;  %v415_v13 = vadd.f32 %v414_v10, %v162_v1  ;;  %v416_v14 = vpop.f32.mrb[10].mxu1  ;;  %v3782_v2 = vld [vmem:[%s4971_s3 + $0x150] sm:$0xff]  }
 0x160   :  { %v425_v15 = vmax.f32 %v413_v9, 0.0  ;;  %v417_v16 = vpop.f32.mrb[11].mxu1  ;;  %v3783_v3 = vld [vmem:[%s4971_s3 + $0x110] sm:$0xff]   ;;  %v3789_v9 = vld [vmem:[%s4971_s3 + $0x128] sm:$0xff]  }
 0x161   :  { %v426_v18 = vmax.f32 %v415_v13, 0.0  ;;  %v474_v30 = vrot.slane %v467_v11, %v473_v26  ;;  %v3790_v10 = vld [vmem:[%s4971_s3 + $0x170] sm:$0xff]   ;;  %v3792_v16 = vld [vmem:[%s4971_s3 + $0x178] sm:$0xff]  }
 0x162   :  { %v451_v22 = vcombine.low %v423_v8, %v425_v15  ;;  %v3788_v8 = vld [vmem:[%s4971_s3 + $0x168] sm:$0xff]   ;;  %v3791_v15 = vld [vmem:[%s4971_s3 + $0x130] sm:$0xff]  }
 0x163   :  { %v459_v21 = vcombine.low %v424_v12, %v426_v18 }
 0x164   :  { %v458_v24 = vrot.slane %v451_v22, %v4444_v55 }
 0x165   :  { %v466_v28 = vrot.slane %v459_v21, %v4444_v55 }
 0x167   :  { %v475_v29 = vcombine.low %v458_v24, %v466_v28  ;;  %v3793_v24 = vld [vmem:[%s4971_s3 + $0x138] sm:$0xff]  }
 0x169   :  { %v482_v31 = vrot.slane %v475_v29, %v473_v26 }
 0x16b   :  { %v483_v32 = vcombine.low %v474_v30, %v482_v31  ;;  %v484_v33 = vcombine.high %v474_v30, %v482_v31  ;;  %v3794_v30 = vld [vmem:[%s4973_s5 + $0x40] sm:$0xff]  }
 0x16c   :  { %v3795_v31 = vld [vmem:[%s4973_s5] sm:$0xff]   ;;  %3525 = vmatprep.subr.bf16.mxu1 %v3794_v30 }
 0x16d   :  { %v487_v38 = vrot.slane %v483_v32, 7  ;;  %v488_v39 = vrot.slane %v484_v33, 7  ;;  %v3796_v32 = vld [vmem:[%s4973_s5 + $0x48] sm:$0xff]   ;;  %v3797_v33 = vld [vmem:[%s4973_s5 + $0xc0] sm:$0xff]  }
 0x16f   :  { %491 = vst [vmem:[#allocation2] sm:$0xfe] %v487_v38  ;;  %492 = vst [vmem:[#allocation2 + $0x10] sm:$0x1] %v487_v38  ;;  %v3803_v38 = vld [vmem:[%s4973_s5 + $0x88] sm:$0xff]  }
 0x170   :  { %493 = vst [vmem:[#allocation2 + $0x20] sm:$0xfe] %v488_v39  ;;  %494 = vst [vmem:[#allocation2 + $0x30] sm:$0x1] %v488_v39  ;;  %v3802_v39 = vld [vmem:[%s4973_s5 + $0x10] sm:$0xff]  }
 0x176   :  { %v495_v48 = vld [vmem:[#allocation2] sm:$0xff]  ;;  %v501_v53 = vld [vmem:[#allocation2 + $0x10] sm:$0x1] }
 0x177   :  { %v497_v49 = vld [vmem:[#allocation2 + $0x20] sm:$0xff]  ;;  %v505_v56 = vld [vmem:[#allocation2 + $0x30] sm:$0x1]  ;;  %v517_v58 = vrot.slane %v501_v53, 1  ;;  %v3817_v53 = vld [vmem:[%s4973_s5 + $0xe8] sm:$0xff]  }
 0x178   :  { %v499_v50 = vld [vmem:[#allocation2] sm:$0xfe]  ;;  %v565_v52 = vpack.c.bf16 %v497_v49, %v495_v48  ;;  %v523_v60 = vrot.slane %v505_v56, 1  ;;  %v534_v12 = vld [vmem:[#allocation2 + $0x10] sm:$0x3]  ;;  %v3812_v48 = vld [vmem:[%s4973_s5 + $0x68] sm:$0xff]  }
 0x179   :  { %v503_v54 = vld [vmem:[#allocation2 + $0x20] sm:$0xfe]  ;;  %v516_v57 = vrot.slane %v499_v50, 1  ;;  %v538_v14 = vld [vmem:[#allocation2 + $0x30] sm:$0x3]  ;;  %v550_v18 = vrot.slane %v534_v12, 2 }
 0x17a   :  { %v522_v59 = vrot.slane %v503_v54, 1  ;;  %995 = vmatmul.mubr.bf16.vlgmr.msra.gmra.mrb[4].mxu0 %v565_v52  ;;  %v532_v11 = vld [vmem:[#allocation2] sm:$0xfc]  ;;  %v556_v21 = vrot.slane %v538_v14, 2  ;;  %v3814_v50 = vld [vmem:[%s4973_s5 + $0x28] sm:$0xff]   ;;  %v3816_v52 = vld [vmem:[%s4973_s5 + $0x70] sm:$0xff]  }
 0x17b   :  { %3504 = vmatpush3.bf16.msra.mxu0 %v3779_v46  ;;  %v518_v61 = vsel %vm515_vm1, %v516_v57, %v517_v58  ;;  %1076 = vmatprep.mubr.bf16.mxu0 %v570_v51  ;;  %v536_v13 = vld [vmem:[#allocation2 + $0x20] sm:$0xfc]  ;;  %v549_v17 = vrot.slane %v532_v11, 2  ;;  %v3818_v54 = vld [vmem:[%s4973_s5 + $0x30] sm:$0xff]   ;;  %v3819_v56 = vld [vmem:[%s4973_s5 + $0xa8] sm:$0xff]  }
 0x17c   :  { %v524_v62 = vsel %vm515_vm1, %v522_v59, %v523_v60  ;;  %3505 = vmatprep.subr.bf16.mxu0 %v3780_v47  ;;  %v555_v22 = vrot.slane %v536_v13, 2  ;;  %v3810_v46 = vld [vmem:[%s4973_s5 + $0x20] sm:$0xff]   ;;  %v3811_v47 = vld [vmem:[%s4973_s5 + $0x98] sm:$0xff]   ;;  %v3821_v58 = vld [vmem:[%s4973_s5 + $0xf0] sm:$0xff]  }
 0x17d   :  { %v567_v1 = vpack.c.bf16 %v524_v62, %v518_v61  ;;  %v551_v26 = vsel %vm548_vm2, %v549_v17, %v550_v18  ;;  %v3813_v49 = vld [vmem:[%s4973_s5 + $0xe0] sm:$0xff]   ;;  %v3820_v57 = vld [vmem:[%s4973_s5 + $0x78] sm:$0xff]   ;;  %v3823_v60 = vld [vmem:[%s4973_s5 + $0xb0] sm:$0xff]  }
 0x17e   :  { %v557_v28 = vsel %vm548_vm2, %v555_v22, %v556_v21  ;;  %v3815_v51 = vld [vmem:[%s4973_s5 + $0xa0] sm:$0xff]   ;;  %v3822_v59 = vld [vmem:[%s4973_s5 + $0x38] sm:$0xff]  }
 0x17f   :  { %1036 = vmatmul.mubr.bf16.vlgmr.msra.gmra.mrb[12].mxu1 %v567_v1  ;;  %3506 = vmatpush3.bf16.msra.mxu0 %v3781_v63  ;;  %v569_v29 = vpack.c.bf16 %v557_v28, %v551_v26  ;;  %v3824_v61 = vld [vmem:[%s4973_s5 + $0xf8] sm:$0xff]   ;;  %v3825_v62 = vld [vmem:[%s4973_s5 + $0x140] sm:$0xff]   ;;  %v1102_v63 = vld [vmem:[#allocation2 + $0x8] sm:$0xfe] }
 0x180   :  { %1594 = vmatprep.mubr.bf16.mxu1 %v4121_v5  ;;  %3507 = vmatprep.subr.bf16.mxu0 %v3782_v2  ;;  %v3787_v5 = vld [vmem:[%s4971_s3 + $0x120] sm:$0xff]   ;;  %v1104_v1 = vld [vmem:[#allocation2 + $0x18] sm:$0x1]  ;;  %v1106_v2 = vld [vmem:[#allocation2 + $0x28] sm:$0xfe] }
 0x181   :  { %3526 = vmatpush3.bf16.msra.mxu1 %v3795_v31  ;;  %v3256_v13 = vld [vmem:[#allocation6] ss:$0 sm:$0xff] }
 0x182   :  { %3527 = vmatprep.subr.bf16.mxu1 %v3796_v32 }
 0x183   :  { %3508 = vmatpush3.bf16.msra.mxu0 %v3783_v3  ;;  %v3826_v3 = vld [vmem:[%s4973_s5 + $0xb8] sm:$0xff]  }
 0x184   :  { %3509 = vmatprep.subr.bf16.mxu0 %v3784_v4  ;;  %v1108_v4 = vld [vmem:[#allocation2 + $0x38] sm:$0x1] }
 0x185   :  { %3528 = vmatpush3.bf16.msra.mxu1 %v3798_v36 }
 0x186   :  { %3529 = vmatprep.subr.bf16.mxu1 %v3800_v37 }
 0x187   :  { %3510 = vmatpush3.bf16.msra.mxu0 %v3785_v6  ;;  %v1120_v6 = vrot.slane %v1102_v63, 1 }
 0x188   :  { %3511 = vmatprep.subr.bf16.mxu0 %v3786_v7  ;;  %v1121_v7 = vrot.slane %v1104_v1, 1 }
 0x189   :  { %3530 = vmatpush3.bf16.msra.mxu1 %v3802_v39 }
 0x18a   :  { %3531 = vmatprep.subr.bf16.mxu1 %v3804_v40 }
 0x18b   :  { %3512 = vmatpush3.bf16.msra.mxu0 %v3787_v5  ;;  %v1126_v5 = vrot.slane %v1106_v2, 1 }
 0x18c   :  { %3513 = vmatprep.subr.bf16.mxu0 %v3788_v8  ;;  %v1127_v8 = vrot.slane %v1108_v4, 1 }
 0x18d   :  { %3532 = vmatpush3.bf16.msra.mxu1 %v3806_v42 }
 0x18e   :  { %3533 = vmatprep.subr.bf16.mxu1 %v3808_v44 }
 0x18f   :  { %3514 = vmatpush3.bf16.msra.mxu0 %v3789_v9  ;;  %v1122_v9 = vsel %vm515_vm1, %v1120_v6, %v1121_v7 }
 0x190   :  { %3515 = vmatprep.subr.bf16.mxu0 %v3790_v10  ;;  %v1128_v10 = vsel %vm515_vm1, %v1126_v5, %v1127_v8  ;;  %v3828_v5 = vld [vmem:[%s4973_s5 + $0x148] sm:$0xff]  }
 0x191   :  { %3534 = vmatpush3.bf16.msra.mxu1 %v3810_v46  ;;  %v1168_v11 = vpack.c.bf16 %v1128_v10, %v1122_v9  ;;  %v1136_v46 = vld [vmem:[#allocation2 + $0x18] sm:$0x3] }
 0x192   :  { %3535 = vmatprep.subr.bf16.mxu1 %v3812_v48  ;;  %v1140_v48 = vld [vmem:[#allocation2 + $0x38] sm:$0x3] }
 0x193   :  { %3516 = vmatpush3.bf16.msra.mxu0 %v3791_v15 }
 0x194   :  { %3517 = vmatprep.subr.bf16.mxu0 %v3792_v16 }
 0x195   :  { %3536 = vmatpush3.bf16.msra.mxu1 %v3814_v50 }
 0x196   :  { %3537 = vmatprep.subr.bf16.mxu1 %v3816_v52 }
 0x197   :  { %3518 = vmatpush3.bf16.msra.mxu0 %v3793_v24 }
 0x198   :  { %3547 = vmatprep.subr.bf16.mxu0 %v3797_v33 }
 0x199   :  { %3538 = vmatpush3.bf16.msra.mxu1 %v3818_v54 }
 0x19a   :  { %1077 = vmatmul.mubr.bf16.vlgmr.msra.gmra.mrb[8].mxu0 %v569_v29  ;;  %3539 = vmatprep.subr.bf16.mxu1 %v3820_v57 }
 0x19b   :  { %3548 = vmatpush3.bf16.msra.mxu0 %v3799_v34  ;;  %1635 = vmatprep.mubr.bf16.mxu0 %v1168_v11  ;;  %v3829_v11 = vld [vmem:[%s4973_s5 + $0x108] sm:$0xff]  }
 0x19c   :  { %3549 = vmatprep.subr.bf16.mxu0 %v3801_v35 }
 0x19d   :  { %3540 = vmatpush3.bf16.msra.mxu1 %v3822_v59 }
 0x19e   :  { %3569 = vmatprep.subr.bf16.mxu1 %v3825_v62 }
 0x19f   :  { %3550 = vmatpush3.bf16.msra.mxu0 %v3803_v38 }
 0x1a0   :  { %3551 = vmatprep.subr.bf16.mxu0 %v3805_v41 }
 0x1a3   :  { %3552 = vmatpush3.bf16.msra.mxu0 %v3807_v43 }
 0x1a4   :  { %3553 = vmatprep.subr.bf16.mxu0 %v3809_v45  ;;  %v1134_v45 = vld [vmem:[#allocation2 + $0x8] sm:$0xfc] }
 0x1a5   :  { %v1152_v50 = vrot.slane %v1134_v45, 2  ;;  %v3853_v45 = vld [vmem:[#allocation9 + $0x2c] ss:$16 sps:$4 sm:$0xff]  }
 0x1a7   :  { %3554 = vmatpush3.bf16.msra.mxu0 %v3811_v47  ;;  %v1138_v47 = vld [vmem:[#allocation2 + $0x28] sm:$0xfc] }
 0x1a8   :  { %3555 = vmatprep.subr.bf16.mxu0 %v3813_v49  ;;  %v1158_v52 = vrot.slane %v1138_v47, 2  ;;  %v3851_v47 = vld [vmem:[#allocation9 + $0x28] ss:$16 sps:$4 sm:$0xff]  }
 0x1ab   :  { %3556 = vmatpush3.bf16.msra.mxu0 %v3815_v51  ;;  %v1153_v51 = vrot.slane %v1136_v46, 2  ;;  %v3848_v46 = vld [vmem:[#allocation9 + $0x20] ss:$16 sps:$4 sm:$0xff]  }
 0x1ac   :  { %3557 = vmatprep.subr.bf16.mxu0 %v3817_v53  ;;  %v1159_v53 = vrot.slane %v1140_v48, 2  ;;  %v3856_v48 = vld [vmem:[#allocation9 + $0x44] ss:$16 sps:$4 sm:$0xff]  }
 0x1ad   :  { %v1154_v54 = vsel %vm548_vm2, %v1152_v50, %v1153_v51  ;;  %v3854_v50 = vld [vmem:[#allocation9 + $0x40] ss:$16 sps:$4 sm:$0xff]   ;;  %v3862_v51 = vld [vmem:[#allocation9 + $0x64] ss:$16 sps:$4 sm:$0xff]  }
 0x1af   :  { %3558 = vmatpush3.bf16.msra.mxu0 %v3819_v56  ;;  %v1160_v56 = vsel %vm548_vm2, %v1158_v52, %v1159_v53  ;;  %v3865_v52 = vld [vmem:[#allocation9 + $0x6c] ss:$16 sps:$4 sm:$0xff]   ;;  %v3860_v53 = vld [vmem:[#allocation9 + $0x60] ss:$16 sps:$4 sm:$0xff]  }
 0x1b0   :  { %3559 = vmatprep.subr.bf16.mxu0 %v3821_v58 }
 0x1b3   :  { %3560 = vmatpush3.bf16.msra.mxu0 %v3823_v60  ;;  %v3827_v60 = vld [vmem:[%s4973_s5 + $0x100] sm:$0xff]  }
 0x1b4   :  { %3561 = vmatprep.subr.bf16.mxu0 %v3824_v61 }
 0x1b7   :  { %3562 = vmatpush3.bf16.msra.mxu0 %v3826_v3  ;;  %v1170_v3 = vpack.c.bf16 %v1160_v56, %v1154_v54  ;;  %v3863_v54 = vld [vmem:[#allocation9 + $0x68] ss:$16 sps:$4 sm:$0xff]   ;;  %v3868_v56 = vld [vmem:[#allocation9 + $0x84] ss:$16 sps:$4 sm:$0xff]  }
 0x24d   :  { %v3475_v12 = vpop.f32.mrb[4].mxu0 }
 0x24e   :  { %v3476_v14 = vpop.f32.mrb[5].mxu0 }
 0x24f   :  { %v3477_v15 = vadd.f32 %v3476_v14, %v3475_v12  ;;  %v3478_v16 = vpop.f32.mrb[6].mxu0  ;;  %v3830_v12 = vld [vmem:[%s4973_s5 + $0x150] sm:$0xff]   ;;  %v3832_v14 = vld [vmem:[%s4973_s5 + $0x158] sm:$0xff]  }
 0x250   :  { %v3479_v17 = vpop.f32.mrb[7].mxu0 }
 0x251   :  { %v997_v18 = vadd.f32 %v3477_v15, %v3256_v13  ;;  %v3480_v22 = vadd.f32 %v3479_v17, %v3478_v16  ;;  %v3833_v15 = vld [vmem:[%s4973_s5 + $0x118] sm:$0xff]   ;;  %v3834_v16 = vld [vmem:[%s4973_s5 + $0x160] sm:$0xff]  }
 0x252   :  { %v3497_v21 = vpop.f32.mrb[12].mxu1  ;;  %v3835_v17 = vld [vmem:[%s4973_s5 + $0x120] sm:$0xff]  }
 0x253   :  { %v3498_v24 = vpop.f32.mrb[13].mxu1  ;;  %v1000_v26 = vadd.f32 %v3480_v22, %v3256_v13  ;;  %v3831_v13 = vld [vmem:[%s4973_s5 + $0x110] sm:$0xff]   ;;  %v3837_v22 = vld [vmem:[%s4973_s5 + $0x128] sm:$0xff]  }
 0x254   :  { %v3499_v28 = vadd.f32 %v3498_v24, %v3497_v21  ;;  %v3500_v29 = vpop.f32.mrb[14].mxu1  ;;  %v3838_v21 = vld [vmem:[%s4973_s5 + $0x170] sm:$0xff]  }
 0x255   :  { %v3501_v30 = vpop.f32.mrb[15].mxu1 }
 0x256   :  { %v1038_v31 = vadd.f32 %v3499_v28, %v997_v18  ;;  %v3502_v32 = vadd.f32 %v3501_v30, %v3500_v29  ;;  %v3836_v18 = vld [vmem:[%s4973_s5 + $0x168] sm:$0xff]   ;;  %v3839_v28 = vld [vmem:[%s4973_s5 + $0x130] sm:$0xff]   ;;  %v3840_v29 = vld [vmem:[%s4973_s5 + $0x178] sm:$0xff]  }
 0x258   :  { %v1041_v33 = vadd.f32 %v3502_v32, %v1000_v26 }
 0x26d   :  { %v3519_v34 = vpop.f32.mrb[8].mxu0 }
 0x26e   :  { %v3520_v35 = vpop.f32.mrb[9].mxu0 }
 0x26f   :  { %v3521_v36 = vadd.f32 %v3520_v35, %v3519_v34  ;;  %v3522_v37 = vpop.f32.mrb[10].mxu0  ;;  %v3841_v34 = vld [vmem:[%s4973_s5 + $0x138] sm:$0xff]  }
 0x270   :  { %v3523_v38 = vpop.f32.mrb[11].mxu0 }
 0x271   :  { %v1079_v39 = vadd.f32 %v3521_v36, %v1038_v31  ;;  %v3524_v40 = vadd.f32 %v3523_v38, %v3522_v37 }
 0x273   :  { %v1085_v41 = vmax.f32 %v1079_v39, 0.0  ;;  %v1082_v42 = vadd.f32 %v3524_v40, %v1041_v33  ;;  %v3842_v40 = vld [vmem:[#allocation9] ss:$16 sps:$4 sm:$0xff]  }
 0x275   :  { %v1089_v43 = vrot.slane %v1085_v41, 7  ;;  %v1086_v44 = vmax.f32 %v1082_v42, 0.0  ;;  %v3844_v41 = vld [vmem:[#allocation9 + $0x4] ss:$16 sps:$4 sm:$0xff]   ;;  %v3845_v42 = vld [vmem:[#allocation9 + $0x8] ss:$16 sps:$4 sm:$0xff]  }
 0x276   :  { %1902 = vmatprep.subr.bf16.mxu0 %v3844_v41 }
 0x277   :  { %1093 = vst [vmem:[#allocation2] sm:$0xfe] %v1089_v43  ;;  %1094 = vst [vmem:[#allocation2 + $0x10] sm:$0x1] %v1089_v43  ;;  %v1090_v49 = vrot.slane %v1086_v44, 7 }
 0x278   :  { %v3847_v43 = vld [vmem:[#allocation9 + $0xc] ss:$16 sps:$4 sm:$0xff]   ;;  %v3850_v44 = vld [vmem:[#allocation9 + $0x24] ss:$16 sps:$4 sm:$0xff]  }
 0x279   :  { %1095 = vst [vmem:[#allocation2 + $0x20] sm:$0xfe] %v1090_v49  ;;  %1096 = vst [vmem:[#allocation2 + $0x30] sm:$0x1] %v1090_v49  ;;  %v3859_v49 = vld [vmem:[#allocation9 + $0x4c] ss:$16 sps:$4 sm:$0xff]  }
 0x27e   :  { %v1101_v57 = vld [vmem:[#allocation2] sm:$0xfe]  ;;  %v1103_v58 = vld [vmem:[#allocation2 + $0x10] sm:$0x1] }
 0x27f   :  { %v1097_v59 = vld [vmem:[#allocation2] sm:$0xff]  ;;  %v1117_v61 = vrot.slane %v1101_v57, 1  ;;  %v1118_v62 = vrot.slane %v1103_v58, 1  ;;  %v1135_v31 = vld [vmem:[#allocation2 + $0x10] sm:$0x3] }
 0x280   :  { %v1099_v63 = vld [vmem:[#allocation2 + $0x20] sm:$0xff]  ;;  %v1107_v2 = vld [vmem:[#allocation2 + $0x30] sm:$0x1]  ;;  %v1150_v36 = vrot.slane %v1135_v31, 2  ;;  %v3871_v57 = vld [vmem:[#allocation9 + $0x8c] ss:$16 sps:$4 sm:$0xff]  }
 0x281   :  { %v1105_v1 = vld [vmem:[#allocation2 + $0x20] sm:$0xfe]  ;;  %v1165_v4 = vpack.c.bf16 %v1099_v63, %v1097_v59  ;;  %v1124_v7 = vrot.slane %v1107_v2, 1  ;;  %v1119_v8 = vsel %vm515_vm1, %v1117_v61, %v1118_v62  ;;  %v1139_v26 = vld [vmem:[#allocation2 + $0x30] sm:$0x3] }
 0x282   :  { %v1123_v6 = vrot.slane %v1105_v1, 1  ;;  %v1137_v24 = vld [vmem:[#allocation2 + $0x20] sm:$0xfc]  ;;  %v1156_v33 = vrot.slane %v1139_v26, 2  ;;  %v3866_v58 = vld [vmem:[#allocation9 + $0x80] ss:$16 sps:$4 sm:$0xff]  }
 0x283   :  { %1595 = vmatmul.mubr.bf16.vlgmr.msra.gmra.mrb[16].mxu1 %v1165_v4  ;;  %v1133_v30 = vld [vmem:[#allocation2] sm:$0xfc]  ;;  %v1155_v32 = vrot.slane %v1137_v24, 2  ;;  %v3877_v63 = vld [vmem:[#allocation9 + $0xac] ss:$16 sps:$4 sm:$0xff]  }
 0x284   :  { %v1125_v9 = vsel %vm515_vm1, %v1123_v6, %v1124_v7  ;;  %3570 = vmatpush3.bf16.msra.mxu1 %v3827_v60  ;;  %1676 = vmatprep.mubr.bf16.mxu1 %v1170_v3  ;;  %v1149_v35 = vrot.slane %v1133_v30, 2  ;;  %v3869_v59 = vld [vmem:[#allocation9 + $0x88] ss:$16 sps:$4 sm:$0xff]   ;;  %v3872_v60 = vld [vmem:[#allocation9 + $0xa0] ss:$16 sps:$4 sm:$0xff]  }
 0x285   :  { %v1167_v10 = vpack.c.bf16 %v1125_v9, %v1119_v8  ;;  %3571 = vmatprep.subr.bf16.mxu1 %v3828_v5  ;;  %v1157_v37 = vsel %vm548_vm2, %v1155_v32, %v1156_v33  ;;  %v3874_v61 = vld [vmem:[#allocation9 + $0xa4] ss:$16 sps:$4 sm:$0xff]   ;;  %v3875_v62 = vld [vmem:[#allocation9 + $0xa8] ss:$16 sps:$4 sm:$0xff]   ;;  %v3883_v2 = vld [vmem:[#allocation9 + $0xcc] ss:$16 sps:$4 sm:$0xff]  }
 0x286   :  { %v1151_v38 = vsel %vm548_vm2, %v1149_v35, %v1150_v36  ;;  %v3880_v1 = vld [vmem:[#allocation9 + $0xc4] ss:$16 sps:$4 sm:$0xff]   ;;  %v3878_v3 = vld [vmem:[#allocation9 + $0xc0] ss:$16 sps:$4 sm:$0xff]   ;;  %v3881_v4 = vld [vmem:[#allocation9 + $0xc8] ss:$16 sps:$4 sm:$0xff]  }
 0x287   :  { %1636 = vmatmul.mubr.bf16.vlgmr.msra.gmra.mrb[12].mxu0 %v1167_v10  ;;  %v1169_v39 = vpack.c.bf16 %v1157_v37, %v1151_v38  ;;  %v3886_v6 = vld [vmem:[#allocation9 + $0xe4] ss:$16 sps:$4 sm:$0xff]   ;;  %v3889_v7 = vld [vmem:[#allocation9 + $0xec] ss:$16 sps:$4 sm:$0xff]   ;;  %v3884_v5 = vld [vmem:[#allocation9 + $0xe0] ss:$16 sps:$4 sm:$0xff]  }
 0x288   :  { %1934 = vmatprep.mubr.bf16.mxu0 %v4119_v0  ;;  %3572 = vmatpush3.bf16.msra.mxu1 %v3829_v11  ;;  %v3887_v8 = vld [vmem:[#allocation9 + $0xe8] ss:$16 sps:$4 sm:$0xff]   ;;  %v3305_v11 = vld [vmem:[#allocation8] ss:$0 sm:$0xff] }
 0x289   :  { %3573 = vmatprep.subr.bf16.mxu1 %v3830_v12  ;;  %1903 = vmatpush1.bf16.msra.mxu0 %v3842_v40  ;;  %v3890_v9 = vld [vmem:[%s4977_s9 + $0x40] sm:$0xff]  }
 0x28a   :  { %1904 = vmatprep.subr.bf16.mxu0 %v3850_v44  ;;  %v3892_v44 = vld [vmem:[%s4977_s9 + $0xc0] sm:$0xff]  }
 0x28c   :  { %3574 = vmatpush3.bf16.msra.mxu1 %v3831_v13 }
 0x28d   :  { %3575 = vmatprep.subr.bf16.mxu1 %v3832_v14  ;;  %1905 = vmatpush1.bf16.msra.mxu0 %v3848_v46  ;;  %v3894_v46 = vld [vmem:[%s4977_s9 + $0x80] sm:$0xff]  }
 0x28e   :  { %1906 = vmatprep.subr.bf16.mxu0 %v3856_v48  ;;  %v3896_v48 = vld [vmem:[%s4977_s9 + $0xc8] sm:$0xff]  }
 0x290   :  { %3576 = vmatpush3.bf16.msra.mxu1 %v3833_v15 }
 0x291   :  { %3577 = vmatprep.subr.bf16.mxu1 %v3834_v16  ;;  %1907 = vmatpush1.bf16.msra.mxu0 %v3854_v50  ;;  %v3898_v50 = vld [vmem:[%s4977_s9 + $0x88] sm:$0xff]  }
 0x292   :  { %1908 = vmatprep.subr.bf16.mxu0 %v3862_v51  ;;  %v3900_v51 = vld [vmem:[%s4977_s9 + $0xd0] sm:$0xff]  }
 0x294   :  { %3578 = vmatpush3.bf16.msra.mxu1 %v3835_v17 }
 0x295   :  { %3579 = vmatprep.subr.bf16.mxu1 %v3836_v18  ;;  %1909 = vmatpush1.bf16.msra.mxu0 %v3860_v53  ;;  %v3902_v53 = vld [vmem:[%s4977_s9 + $0x90] sm:$0xff]  }
 0x296   :  { %1910 = vmatprep.subr.bf16.mxu0 %v3868_v56  ;;  %v3904_v56 = vld [vmem:[%s4977_s9 + $0xd8] sm:$0xff]  }
 0x298   :  { %3580 = vmatpush3.bf16.msra.mxu1 %v3837_v22 }
 0x299   :  { %3581 = vmatprep.subr.bf16.mxu1 %v3838_v21  ;;  %1911 = vmatpush1.bf16.msra.mxu0 %v3866_v58  ;;  %v3906_v58 = vld [vmem:[%s4977_s9 + $0x98] sm:$0xff]  }
 0x29a   :  { %1912 = vmatprep.subr.bf16.mxu0 %v3874_v61  ;;  %v3909_v61 = vld [vmem:[%s4977_s9 + $0x68] sm:$0xff]  }
 0x29c   :  { %3582 = vmatpush3.bf16.msra.mxu1 %v3839_v28 }
 0x29d   :  { %3583 = vmatprep.subr.bf16.mxu1 %v3840_v29  ;;  %1913 = vmatpush1.bf16.msra.mxu0 %v3872_v60  ;;  %v3908_v60 = vld [vmem:[%s4977_s9 + $0xe0] sm:$0xff]  }
 0x29e   :  { %1914 = vmatprep.subr.bf16.mxu0 %v3880_v1  ;;  %v3912_v1 = vld [vmem:[%s4977_s9 + $0xe8] sm:$0xff]  }
 0x2a0   :  { %3584 = vmatpush3.bf16.msra.mxu1 %v3841_v34 }
 0x2a1   :  { %1945 = vmatprep.subr.bf16.mxu1 %v3847_v43  ;;  %1915 = vmatpush1.bf16.msra.mxu0 %v3878_v3  ;;  %v3914_v3 = vld [vmem:[%s4977_s9 + $0xa8] sm:$0xff]  }
 0x2a2   :  { %1916 = vmatprep.subr.bf16.mxu0 %v3886_v6  ;;  %v3916_v6 = vld [vmem:[%s4977_s9 + $0xf0] sm:$0xff]  }
 0x2a3   :  { %1677 = vmatmul.mubr.bf16.vlgmr.msra.gmra.mrb[20].mxu1 %v1169_v39 }
 0x2a4   :  { %1977 = vmatprep.mubr.bf16.mxu1 %v4119_v0  ;;  %1946 = vmatpush1.bf16.msra.mxu1 %v3845_v42  ;;  %v3857_v0 = vld [vmem:[#allocation9 + $0x48] ss:$16 sps:$4 sm:$0xff]  }
 0x2a5   :  { %1947 = vmatprep.subr.bf16.mxu1 %v3853_v45  ;;  %1917 = vmatpush1.bf16.msra.mxu0 %v3884_v5  ;;  %v3891_v42 = vld [vmem:[%s4977_s9] sm:$0xff]   ;;  %v3893_v45 = vld [vmem:[%s4977_s9 + $0x48] sm:$0xff]   ;;  %v3918_v5 = vld [vmem:[%s4977_s9 + $0xb0] sm:$0xff]  }
 0x2a6   :  { %3591 = vmatprep.subr.bf16.mxu0 %v3890_v9  ;;  %v3920_v9 = vld [vmem:[%s4977_s9 + $0xf8] sm:$0xff]  }
 0x2a8   :  { %1948 = vmatpush1.bf16.msra.mxu1 %v3851_v47  ;;  %v3895_v47 = vld [vmem:[%s4977_s9 + $0x8] sm:$0xff]  }
 0x2a9   :  { %1949 = vmatprep.subr.bf16.mxu1 %v3859_v49  ;;  %v3897_v49 = vld [vmem:[%s4977_s9 + $0x50] sm:$0xff]  }
 0x2ac   :  { %1950 = vmatpush1.bf16.msra.mxu1 %v3857_v0  ;;  %v3899_v0 = vld [vmem:[%s4977_s9 + $0x10] sm:$0xff]  }
 0x2ad   :  { %1951 = vmatprep.subr.bf16.mxu1 %v3865_v52  ;;  %v3901_v52 = vld [vmem:[%s4977_s9 + $0x58] sm:$0xff]  }
 0x2b0   :  { %1952 = vmatpush1.bf16.msra.mxu1 %v3863_v54  ;;  %v3903_v54 = vld [vmem:[%s4977_s9 + $0x18] sm:$0xff]  }
 0x2b1   :  { %1953 = vmatprep.subr.bf16.mxu1 %v3871_v57  ;;  %v3905_v57 = vld [vmem:[%s4977_s9 + $0x60] sm:$0xff]  }
 0x2b4   :  { %1954 = vmatpush1.bf16.msra.mxu1 %v3869_v59  ;;  %v3907_v59 = vld [vmem:[%s4977_s9 + $0x20] sm:$0xff]  }
 0x2b5   :  { %1955 = vmatprep.subr.bf16.mxu1 %v3877_v63  ;;  %v3911_v63 = vld [vmem:[%s4977_s9 + $0x28] sm:$0xff]  }
 0x2b8   :  { %1956 = vmatpush1.bf16.msra.mxu1 %v3875_v62  ;;  %v3910_v62 = vld [vmem:[%s4977_s9 + $0xa0] sm:$0xff]  }
 0x2b9   :  { %1957 = vmatprep.subr.bf16.mxu1 %v3883_v2  ;;  %v3913_v2 = vld [vmem:[%s4977_s9 + $0x70] sm:$0xff]  }
 0x2bc   :  { %1958 = vmatpush1.bf16.msra.mxu1 %v3881_v4  ;;  %v3915_v4 = vld [vmem:[%s4977_s9 + $0x30] sm:$0xff]  }
 0x2bd   :  { %1959 = vmatprep.subr.bf16.mxu1 %v3889_v7  ;;  %v3917_v7 = vld [vmem:[%s4977_s9 + $0x78] sm:$0xff]  }
 0x2c0   :  { %1960 = vmatpush1.bf16.msra.mxu1 %v3887_v8  ;;  %v3919_v8 = vld [vmem:[%s4977_s9 + $0x38] sm:$0xff]  }
 0x2c1   :  { %3619 = vmatprep.subr.bf16.mxu1 %v3892_v44 }
 0x356   :  { %v3541_v10 = vpop.f32.mrb[16].mxu1 }
 0x357   :  { %v3542_v12 = vpop.f32.mrb[17].mxu1 }
 0x358   :  { %v3543_v13 = vadd.f32 %v3542_v12, %v3541_v10  ;;  %v3544_v14 = vpop.f32.mrb[18].mxu1  ;;  %v3921_v10 = vld [vmem:[%s4977_s9 + $0xb8] sm:$0xff]   ;;  %v3924_v12 = vld [vmem:[%s4977_s9 + $0x1c0] sm:$0xff]  }
 0x359   :  { %v3545_v15 = vpop.f32.mrb[19].mxu1 }
 0x35a   :  { %v3563_v16 = vpop.f32.mrb[12].mxu0  ;;  %v1597_v17 = vadd.f32 %v3543_v13, %v3305_v11  ;;  %v3546_v18 = vadd.f32 %v3545_v15, %v3544_v14  ;;  %v1720_v13 = vld [vmem:[#allocation11] sm:$0xf] }
 0x35b   :  { %v3564_v22 = vpop.f32.mrb[13].mxu0  ;;  %v1725_v14 = vrot.slane %v1720_v13, %v133_v20  ;;  %v1733_v15 = vrot.slane %v1720_v13, %v141_v25 }
 0x35c   :  { %v3565_v21 = vadd.f32 %v3564_v22, %v3563_v16  ;;  %v3566_v24 = vpop.f32.mrb[14].mxu0  ;;  %v1600_v26 = vadd.f32 %v3546_v18, %v3305_v11  ;;  %v3922_v11 = vld [vmem:[%s4977_s9 + $0x140] sm:$0xff]   ;;  %v1729_v16 = vrot.slane %v1720_v13, %v137_v23  ;;  %v4124_v18 = vmov 1935823168  }
 0x35d   :  { %v3567_v28 = vpop.f32.mrb[15].mxu0  ;;  %v2103_v22 = vunpack.c.l.s4 %v4124_v18 }
 0x35e   :  { %v1638_v29 = vadd.f32 %v3565_v21, %v1597_v17  ;;  %v3568_v30 = vadd.f32 %v3567_v28, %v3566_v24  ;;  %v1737_v17 = vrot.slane %v1720_v13, %v145_v27 }
 0x35f   :  { %v2104_v20 = vunpack.c.0.s8 %v2103_v22 }
 0x360   :  { %v1641_v31 = vadd.f32 %v3568_v30, %v1600_v26 }
 0x376   :  { %v3585_v32 = vpop.f32.mrb[20].mxu1 }
 0x377   :  { %v3586_v33 = vpop.f32.mrb[21].mxu1 }
 0x378   :  { %v3587_v34 = vadd.f32 %v3586_v33, %v3585_v32  ;;  %v3588_v35 = vpop.f32.mrb[22].mxu1 }
 0x379   :  { %v3589_v36 = vpop.f32.mrb[23].mxu1 }
 0x37a   :  { %v1679_v37 = vadd.f32 %v3587_v34, %v1638_v29  ;;  %v3590_v38 = vadd.f32 %v3589_v36, %v3588_v35 }
 0x37c   :  { %v1682_v39 = vadd.f32 %v3590_v38, %v1641_v31  ;;  %v1685_v40 = vmax.f32 %v1679_v37, 0.0 }
 0x37e   :  { %v1686_v41 = vmax.f32 %v1682_v39, 0.0 }
 0x380   :  { %v1687_v43 = vpack.c.bf16 %v1686_v41, %v1685_v40 }
 0x382   :  { %1935 = vmatmul.mubr.bf16.vlgmr.msra.gmra.mrb[16].mxu0 %v1687_v43  ;;  %1978 = vmatmul.mubr.bf16.vlgmr.msra.gmra.mrb[24].mxu1 %v1687_v43 }
 0x383   :  { %3592 = vmatpush3.bf16.msra.mxu0 %v3891_v42  ;;  %3620 = vmatpush3.bf16.msra.mxu1 %v3894_v46 }
 0x384   :  { %3593 = vmatprep.subr.bf16.mxu0 %v3893_v45  ;;  %3621 = vmatprep.subr.bf16.mxu1 %v3896_v48  ;;  %v2107_v48 = vsub.s32 %v2104_v20, %v4425_v19 }
 0x387   :  { %3594 = vmatpush3.bf16.msra.mxu0 %v3895_v47  ;;  %3622 = vmatpush3.bf16.msra.mxu1 %v3898_v50 }
 0x388   :  { %3595 = vmatprep.subr.bf16.mxu0 %v3897_v49  ;;  %3623 = vmatprep.subr.bf16.mxu1 %v3900_v51 }
 0x38b   :  { %3596 = vmatpush3.bf16.msra.mxu0 %v3899_v0  ;;  %3624 = vmatpush3.bf16.msra.mxu1 %v3902_v53 }
 0x38c   :  { %3597 = vmatprep.subr.bf16.mxu0 %v3901_v52  ;;  %3625 = vmatprep.subr.bf16.mxu1 %v3904_v56 }
 0x38f   :  { %3598 = vmatpush3.bf16.msra.mxu0 %v3903_v54  ;;  %3626 = vmatpush3.bf16.msra.mxu1 %v3906_v58 }
 0x390   :  { %3599 = vmatprep.subr.bf16.mxu0 %v3905_v57  ;;  %3627 = vmatprep.subr.bf16.mxu1 %v3908_v60 }
 0x393   :  { %3600 = vmatpush3.bf16.msra.mxu0 %v3907_v59  ;;  %3628 = vmatpush3.bf16.msra.mxu1 %v3910_v62 }
 0x394   :  { %3601 = vmatprep.subr.bf16.mxu0 %v3909_v61  ;;  %3629 = vmatprep.subr.bf16.mxu1 %v3912_v1 }
 0x397   :  { %3602 = vmatpush3.bf16.msra.mxu0 %v3911_v63  ;;  %3630 = vmatpush3.bf16.msra.mxu1 %v3914_v3 }
 0x398   :  { %3603 = vmatprep.subr.bf16.mxu0 %v3913_v2  ;;  %3631 = vmatprep.subr.bf16.mxu1 %v3916_v6 }
 0x39b   :  { %3604 = vmatpush3.bf16.msra.mxu0 %v3915_v4  ;;  %3632 = vmatpush3.bf16.msra.mxu1 %v3918_v5 }
 0x39c   :  { %3605 = vmatprep.subr.bf16.mxu0 %v3917_v7  ;;  %3633 = vmatprep.subr.bf16.mxu1 %v3920_v9 }
 0x39f   :  { %3606 = vmatpush3.bf16.msra.mxu0 %v3919_v8  ;;  %3634 = vmatpush3.bf16.msra.mxu1 %v3921_v10 }
 0x3a0   :  { %3647 = vmatprep.subr.bf16.mxu0 %v3922_v11  ;;  %3675 = vmatprep.subr.bf16.mxu1 %v3924_v12 }
 0x455   :  { %v1936_v21 = vpop.f32.mrb[16].mxu0  ;;  %v1979_v24 = vpop.f32.mrb[24].mxu1 }
 0x456   :  { %v1937_v26 = vadd.f32 %v1936_v21, %v1725_v14  ;;  %v1980_v28 = vadd.f32 %v1979_v24, %v1733_v15  ;;  %v1938_v29 = vpop.f32.mrb[17].mxu0  ;;  %v1981_v30 = vpop.f32.mrb[25].mxu1 }
 0x457   :  { %v1939_v31 = vadd.f32 %v1938_v29, %v1729_v16  ;;  %v1982_v32 = vadd.f32 %v1981_v30, %v1737_v17  ;;  %v1940_v33 = vpop.f32.mrb[18].mxu0  ;;  %v1983_v34 = vpop.f32.mrb[26].mxu1 }
 0x458   :  { %v1988_v25 = vmax.f32 %v1937_v26, 0.0  ;;  %v1990_v35 = vmax.f32 %v1980_v28, 0.0  ;;  %v1941_v36 = vadd.f32 %v1940_v33, %v1725_v14  ;;  %v1984_v23 = vadd.f32 %v1983_v34, %v1733_v15  ;;  %v1942_v37 = vpop.f32.mrb[19].mxu0  ;;  %v1985_v38 = vpop.f32.mrb[27].mxu1 }
 0x459   :  { %v1989_v27 = vmax.f32 %v1939_v31, 0.0  ;;  %v1991_v39 = vmax.f32 %v1982_v32, 0.0  ;;  %v1943_v40 = vadd.f32 %v1942_v37, %v1729_v16  ;;  %v1986_v41 = vadd.f32 %v1985_v38, %v1737_v17  ;;  %v2228_v37 = vld [vmem:[#allocation3 + $0x40] sm:$0x1] }
 0x45a   :  { %v1992_v42 = vmax.f32 %v1941_v36, 0.0  ;;  %v1994_v43 = vmax.f32 %v1984_v23, 0.0  ;;  %v2225_v23 = vld [vmem:[#allocation3 + $0x10] sm:$0xfe] }
 0x45b   :  { %v2022_v44 = vcombine.low %v1988_v25, %v1989_v27  ;;  %v2023_v45 = vcombine.high %v1988_v25, %v1989_v27  ;;  %v2024_v46 = vcombine.low %v1990_v35, %v1991_v39  ;;  %v2025_v47 = vcombine.high %v1990_v35, %v1991_v39 }
 0x45c   :  { %v1993_v49 = vmax.f32 %v1943_v40, 0.0  ;;  %v1995_v50 = vmax.f32 %v1986_v41, 0.0  ;;  %v4788_v40 = vld [vmem:[#allocation2 + $0x8] sm:$0xff] }
 0x45d   :  { %v2032_v0 = vrot.slane %v2022_v44, %v4444_v55  ;;  %v2039_v51 = vrot.slane %v2023_v45, %v4444_v55  ;;  %v2046_v52 = vrot.slane %v2024_v46, %v4444_v55  ;;  %v2053_v53 = vrot.slane %v2025_v47, %v4444_v55  ;;  %v3923_v45 = vld [vmem:[%s4977_s9 + $0x100] sm:$0xff]  }
 0x45e   :  { %v2058_v54 = vcombine.low %v1992_v42, %v1993_v49  ;;  %v2059_v56 = vcombine.high %v1992_v42, %v1993_v49  ;;  %v2060_v57 = vcombine.low %v1994_v43, %v1995_v50  ;;  %v2061_v58 = vcombine.high %v1994_v43, %v1995_v50  ;;  %v3925_v50 = vld [vmem:[%s4977_s9 + $0x148] sm:$0xff]  }
 0x45f   :  { %v2054_v59 = vcombine.low %v2032_v0, %v2046_v52  ;;  %v2055_v60 = vcombine.high %v2032_v0, %v2046_v52  ;;  %v2056_v61 = vcombine.low %v2039_v51, %v2053_v53  ;;  %v2057_v62 = vcombine.high %v2039_v51, %v2053_v53 }
 0x460   :  { %v2068_v19 = vrot.slane %v2058_v54, %v4444_v55  ;;  %v2075_v63 = vrot.slane %v2059_v56, %v4444_v55  ;;  %v2082_v1 = vrot.slane %v2060_v57, %v4444_v55  ;;  %v2089_v2 = vrot.slane %v2061_v58, %v4444_v55 }
 0x461   :  { %v2108_v3 = vrot.slane %v2054_v59, %v2107_v48  ;;  %v2115_v4 = vrot.slane %v2055_v60, %v2107_v48  ;;  %v2122_v6 = vrot.slane %v2056_v61, %v2107_v48  ;;  %v2129_v7 = vrot.slane %v2057_v62, %v2107_v48 }
 0x462   :  { %v2090_v5 = vcombine.low %v2068_v19, %v2082_v1  ;;  %v2091_v8 = vcombine.high %v2068_v19, %v2082_v1  ;;  %v2092_v9 = vcombine.low %v2075_v63, %v2089_v2  ;;  %v2093_v10 = vcombine.high %v2075_v63, %v2089_v2  ;;  %v3926_v19 = vld [vmem:[%s4977_s9 + $0x180] sm:$0xff]  }
 0x463   :  { %v2166_v11 = vcombine.low %v2108_v3, %v2115_v4  ;;  %v2167_v12 = vcombine.high %v2108_v3, %v2115_v4  ;;  %v2168_v13 = vcombine.low %v2122_v6, %v2129_v7  ;;  %v2169_v14 = vcombine.high %v2122_v6, %v2129_v7  ;;  %v3927_v6 = vld [vmem:[%s4977_s9 + $0x108] sm:$0xff]  }
 0x464   :  { %v2136_v15 = vrot.slane %v2090_v5, %v2107_v48  ;;  %v2143_v16 = vrot.slane %v2091_v8, %v2107_v48  ;;  %v2150_v17 = vrot.slane %v2092_v9, %v2107_v48  ;;  %v2157_v18 = vrot.slane %v2093_v10, %v2107_v48  ;;  %v3928_v7 = vld [vmem:[%s4977_s9 + $0x1c8] sm:$0xff]   ;;  %v3929_v9 = vld [vmem:[%s4977_s9 + $0x150] sm:$0xff]  }
 0x465   :  { %v2175_v22 = vrot.slane %v2166_v11, 7  ;;  %v2176_v21 = vrot.slane %v2167_v12, 7  ;;  %v2177_v24 = vrot.slane %v2168_v13, 7  ;;  %v2179_v55 = vrot.slane %v2169_v14, 7  ;;  %v3930_v13 = vld [vmem:[%s4977_s9 + $0x188] sm:$0xff]  }
 0x466   :  { %v2170_v26 = vcombine.low %v2136_v15, %v2143_v16  ;;  %v2171_v28 = vcombine.high %v2136_v15, %v2143_v16  ;;  %v2172_v29 = vcombine.low %v2150_v17, %v2157_v18  ;;  %v2173_v30 = vcombine.high %v2150_v17, %v2157_v18  ;;  %v3931_v17 = vld [vmem:[%s4977_s9 + $0x110] sm:$0xff]  }
 0x467   :  { %v4777_v31 = vsel %vm2174_vm3, %v2175_v22, %v2177_v24  ;;  %v4780_v32 = vsel %vm2174_vm3, %v2176_v21, %v2179_v55  ;;  %2199 = vst [vmem:[#allocation3] sm:$0xfe] %v2175_v22  ;;  %2200 = vst [vmem:[#allocation3 + $0x8] sm:$0xfe] %v2176_v21  ;;  %v4791_v41 = vrot.slane %v4788_v40, 1  ;;  %v2259_v42 = vrot.slane %v2225_v23, 1 }
 0x468   :  { %2203 = vst [vmem:[#allocation3 + $0x30] sm:$0x1] %v2177_v24  ;;  %2204 = vst [vmem:[#allocation3 + $0x38] sm:$0x1] %v2179_v55  ;;  %v2181_v20 = vrot.slane %v2170_v26, 7  ;;  %v2182_v33 = vrot.slane %v2171_v28, 7  ;;  %v2363_v53 = vpack.c.bf16 %v4788_v40, %v4788_v40 }
 0x469   :  { %v2183_v34 = vrot.slane %v2172_v29, 7  ;;  %v2185_v25 = vrot.slane %v2173_v30, 7  ;;  %v2254_v48 = vrot.slane %v4777_v31, 1  ;;  %v2266_v0 = vrot.slane %v2228_v37, 1  ;;  %v3932_v18 = vld [vmem:[%s4977_s9 + $0x1d0] sm:$0xff]   ;;  %v3933_v22 = vld [vmem:[%s4977_s9 + $0x158] sm:$0xff]  }
 0x46a   :  { %2205 = vst [vmem:[#allocation3 + $0x48] sm:$0xfe] %v2181_v20  ;;  %2206 = vst [vmem:[#allocation3 + $0x50] sm:$0xfe] %v2182_v33  ;;  %v2261_v2 = vsel %vm515_vm1, %v2259_v42, %v4791_v41  ;;  %v2323_v15 = vrot.slane %v4780_v32, 2  ;;  %v3934_v55 = vld [vmem:[%s4977_s9 + $0x190] sm:$0xff]  }
 0x46b   :  { %v4783_v35 = vsel %vm2174_vm3, %v2181_v20, %v2183_v34  ;;  %v4786_v36 = vsel %vm2174_vm3, %v2182_v33, %v2185_v25  ;;  %2209 = vst [vmem:[#allocation3 + $0x78] sm:$0x1] %v2183_v34  ;;  %2210 = vst [vmem:[#allocation3 + $0x80] sm:$0x1] %v2185_v25  ;;  %v2267_v5 = vsel %vm515_vm1, %v4791_v41, %v2266_v0  ;;  %v3935_v26 = vld [vmem:[%s4977_s9 + $0x118] sm:$0xff]   ;;  %v3937_v30 = vld [vmem:[%s4977_s9 + $0x160] sm:$0xff]  }
 0x46c   :  { %v2269_v57 = vrot.slane %v4783_v35, 1  ;;  %v2366_v14 = vpack.c.bf16 %v2267_v5, %v2261_v2  ;;  %v3936_v28 = vld [vmem:[%s4977_s9 + $0x1d8] sm:$0xff]   ;;  %v3939_v33 = vld [vmem:[%s4977_s9 + $0x120] sm:$0xff]   ;;  %v3941_v25 = vld [vmem:[%s4977_s9 + $0x168] sm:$0xff]   ;;  %v2320_v5 = vrot.slane %v4777_v31, 2 }
 0x46d   :  { %v3938_v20 = vld [vmem:[%s4977_s9 + $0x198] sm:$0xff]   ;;  %v3940_v34 = vld [vmem:[%s4977_s9 + $0x1e0] sm:$0xff]   ;;  %v3943_v37 = vld [vmem:[%s4977_s9 + $0x128] sm:$0xff]  }
 0x46e   :  { %v2212_v38 = vld [vmem:[#allocation3 + $0x8] sm:$0xff]  ;;  %v2211_v27 = vld [vmem:[#allocation3] sm:$0xff] }
 0x46f   :  { %v2223_v39 = vld [vmem:[#allocation3] sm:$0xfe]  ;;  %v2362_v43 = vpack.c.bf16 %v4780_v32, %v2212_v38  ;;  %v2361_v44 = vpack.c.bf16 %v4777_v31, %v2211_v27  ;;  %v2226_v46 = vld [vmem:[#allocation3 + $0x30] sm:$0x1]  ;;  %v2296_v63 = vld [vmem:[#allocation3 + $0x8] sm:$0xfc] }
 0x470   :  { %v2253_v47 = vrot.slane %v2223_v39, 1  ;;  %v2262_v49 = vrot.slane %v2226_v46, 1  ;;  %v2299_v1 = vld [vmem:[#allocation3 + $0x38] sm:$0x3]  ;;  %v2322_v11 = vrot.slane %v2296_v63, 2  ;;  %v3942_v23 = vld [vmem:[%s4977_s9 + $0x1a0] sm:$0xff]  }
 0x471   :  { %2994 = vmatprep.mubr.bf16.mxu0 %v2362_v43  ;;  %v2218_v51 = vld [vmem:[#allocation3 + $0x50] sm:$0xff]  ;;  %v2229_v54 = vld [vmem:[#allocation3 + $0x48] sm:$0xfe]  ;;  %v2330_v12 = vrot.slane %v2299_v1, 2  ;;  %v2231_v39 = vld [vmem:[#allocation3 + $0x58] sm:$0xfe] }
 0x472   :  { %v2255_v52 = vsel %vm515_vm1, %v2253_v47, %v2254_v48  ;;  %v2232_v56 = vld [vmem:[#allocation3 + $0x78] sm:$0x1]  ;;  %2995 = vmatmul.mubr.bf16.vlgmr.msra.gmra.mrb[20].mxu0 %v2361_v44  ;;  %v2371_v58 = vpack.c.bf16 %v4786_v36, %v2218_v51  ;;  %v2263_v59 = vsel %vm515_vm1, %v2254_v48, %v2262_v49  ;;  %v2268_v60 = vrot.slane %v2229_v54, 1  ;;  %v2217_v10 = vld [vmem:[#allocation3 + $0x48] sm:$0xff]  ;;  %v3945_v27 = vld [vmem:[%s4977_s9 + $0x170] sm:$0xff]  }
 0x473   :  { %v2277_v61 = vrot.slane %v2232_v56, 1  ;;  %3648 = vmatpush3.bf16.msra.mxu0 %v3923_v45  ;;  %v2364_v62 = vpack.c.bf16 %v2263_v59, %v2255_v52  ;;  %v2370_v16 = vpack.c.bf16 %v4783_v35, %v2217_v10  ;;  %v2324_v21 = vsel %vm548_vm2, %v2322_v11, %v2323_v15  ;;  %v3944_v38 = vld [vmem:[%s4977_s9 + $0x1e8] sm:$0xff]   ;;  %v2227_v45 = vld [vmem:[#allocation3 + $0x38] sm:$0x1]  ;;  %v3947_v46 = vld [vmem:[%s4977_s9 + $0x130] sm:$0xff]  }
 0x474   :  { %3002 = vmatprep.mubr.bf16.mxu0 %v2371_v58  ;;  %3649 = vmatprep.subr.bf16.mxu0 %v3925_v50  ;;  %v2270_v3 = vsel %vm515_vm1, %v2268_v60, %v2269_v57  ;;  %v2331_v24 = vsel %vm548_vm2, %v2323_v15, %v2330_v12  ;;  %v2234_v42 = vld [vmem:[#allocation3 + $0x88] sm:$0x1]  ;;  %v2224_v44 = vld [vmem:[#allocation3 + $0x8] sm:$0xfe]  ;;  %v3948_v47 = vld [vmem:[%s4977_s9 + $0x1f0] sm:$0xff]   ;;  %v2274_v49 = vrot.slane %v2231_v39, 1 }
 0x475   :  { %v2278_v4 = vsel %vm515_vm1, %v2269_v57, %v2277_v61  ;;  %3043 = vmatprep.mubr.bf16.mxu1 %v2364_v62  ;;  %v2368_v29 = vpack.c.bf16 %v2331_v24, %v2324_v21  ;;  %v3946_v43 = vld [vmem:[%s4977_s9 + $0x1a8] sm:$0xff]   ;;  %v3949_v48 = vld [vmem:[%s4977_s9 + $0x178] sm:$0xff]   ;;  %v2281_v50 = vrot.slane %v2234_v42, 1  ;;  %v2256_v0 = vrot.slane %v2224_v44, 1  ;;  %v2295_v52 = vld [vmem:[#allocation3] sm:$0xfc] }
 0x476   :  { %v2373_v8 = vpack.c.bf16 %v2278_v4, %v2270_v3  ;;  %3044 = vmatmul.mubr.bf16.vlgmr.msra.gmra.mrb[28].mxu1 %v2363_v53  ;;  %v2264_v51 = vrot.slane %v2227_v45, 1  ;;  %v3950_v54 = vld [vmem:[%s4977_s9 + $0x1b0] sm:$0xff]   ;;  %v2305_v57 = vld [vmem:[#allocation3 + $0x80] sm:$0x3]  ;;  %v2257_v58 = vrot.slane %v4780_v32, 1  ;;  %v3951_v59 = vld [vmem:[%s4977_s9 + $0x138] sm:$0xff]   ;;  %v2276_v32 = vsel %vm515_vm1, %v2274_v49, %v4791_v41 }
 0x477   :  { %3676 = vmatpush3.bf16.msra.mxu1 %v3926_v19  ;;  %3650 = vmatpush3.bf16.msra.mxu0 %v3927_v6  ;;  %v2302_v56 = vld [vmem:[#allocation3 + $0x50] sm:$0xfc]  ;;  %v3952_v60 = vld [vmem:[%s4977_s9 + $0x1f8] sm:$0xff]   ;;  %v3954_v61 = vld [vmem:[%s4977_s9 + $0x200] sm:$0xff]   ;;  %v2319_v62 = vrot.slane %v2295_v52, 2  ;;  %v2282_v63 = vsel %vm515_vm1, %v4791_v41, %v2281_v50  ;;  %v2345_v6 = vrot.slane %v2305_v57, 2 }
 0x478   :  { %3051 = vmatprep.mubr.bf16.mxu1 %v2373_v8  ;;  %3677 = vmatprep.subr.bf16.mxu1 %v3928_v7  ;;  %v2297_v1 = vld [vmem:[#allocation3 + $0x10] sm:$0xfc]  ;;  %v2258_v2 = vsel %vm515_vm1, %v2256_v0, %v2257_v58  ;;  %v2265_v3 = vsel %vm515_vm1, %v2257_v58, %v2264_v51  ;;  %v2337_v4 = vrot.slane %v2302_v56, 2  ;;  %v2300_v7 = vld [vmem:[#allocation3 + $0x40] sm:$0x3]  ;;  %v3953_v8 = vld [vmem:[%s4977_s9 + $0x1b8] sm:$0xff]   ;;  %v2375_v12 = vpack.c.bf16 %v2282_v63, %v2276_v32 }
 0x479   :  { %3651 = vmatprep.subr.bf16.mxu0 %v3929_v9  ;;  %v2230_v9 = vld [vmem:[#allocation3 + $0x50] sm:$0xfe]  ;;  %v2233_v10 = vld [vmem:[#allocation3 + $0x80] sm:$0x1]  ;;  %v2338_v11 = vrot.slane %v4786_v36, 2  ;;  %v4915_v41 = vrot.slane %v4788_v40, 2  ;;  %v2321_v31 = vsel %vm548_vm2, %v2319_v62, %v2320_v5 }
 0x47a   :  { %3003 = vmatmul.mubr.bf16.gmra.mrb[24].mxu0 %v2370_v16  ;;  %v3955_v16 = vld [vmem:[%s4977_s9 + $0x208] sm:$0xff]   ;;  %v2279_v21 = vrot.slane %v2233_v10, 1  ;;  %v3961_v0 = vld [vmem:[%s4977_s9 + $0x238] sm:$0xff]   ;;  %v3386_v56 = vld [vmem:[#allocation12] ss:$0 sm:$0xff] }
 0x47b   :  { %3678 = vmatpush3.bf16.msra.mxu1 %v3930_v13  ;;  %3092 = vmatprep.mubr.bf16.mxu0 %v2366_v14  ;;  %v2325_v13 = vrot.slane %v2297_v1, 2  ;;  %v2365_v14 = vpack.c.bf16 %v2265_v3, %v2258_v2  ;;  %v2346_v40 = vsel %vm548_vm2, %v2338_v11, %v2345_v6  ;;  %v2301_v24 = vld [vmem:[#allocation3 + $0x48] sm:$0xfc] }
 0x47c   :  { %3652 = vmatpush3.bf16.msra.mxu0 %v3931_v17  ;;  %3679 = vmatprep.subr.bf16.mxu1 %v3932_v18  ;;  %v2332_v17 = vrot.slane %v2300_v7, 2  ;;  %v2339_v18 = vsel %vm548_vm2, %v2337_v4, %v2338_v11  ;;  %v3959_v45 = vld [vmem:[%s4977_s9 + $0x228] sm:$0xff]  }
 0x47d   :  { %3653 = vmatprep.subr.bf16.mxu0 %v3933_v22  ;;  %v2271_v22 = vrot.slane %v2230_v9, 1 }
 0x47e   :  { %3052 = vmatmul.mubr.bf16.gmra.mrb[32].mxu1 %v2363_v53  ;;  %v2298_v53 = vld [vmem:[#allocation3 + $0x30] sm:$0x3] }
 0x47f   :  { %3680 = vmatpush3.bf16.msra.mxu1 %v3934_v55  ;;  %3141 = vmatprep.mubr.bf16.mxu1 %v2368_v29  ;;  %v2328_v19 = vrot.slane %v2298_v53, 2  ;;  %v2304_v55 = vld [vmem:[#allocation3 + $0x78] sm:$0x3]  ;;  %v2327_v29 = vsel %vm548_vm2, %v2325_v13, %v4915_v41 }
 0x480   :  { %3654 = vmatpush3.bf16.msra.mxu0 %v3935_v26  ;;  %3681 = vmatprep.subr.bf16.mxu1 %v3936_v28  ;;  %v2272_v26 = vrot.slane %v4786_v36, 1 }
 0x481   :  { %3655 = vmatprep.subr.bf16.mxu0 %v3937_v30  ;;  %v2329_v15 = vsel %vm548_vm2, %v2320_v5, %v2328_v19  ;;  %v2377_v30 = vpack.c.bf16 %v2346_v40, %v2339_v18 }
 0x482   :  { %v2367_v28 = vpack.c.bf16 %v2329_v15, %v2321_v31  ;;  %v2273_v36 = vsel %vm515_vm1, %v2271_v22, %v2272_v26 }
 0x483   :  { %3682 = vmatpush3.bf16.msra.mxu1 %v3938_v20  ;;  %v3956_v20 = vld [vmem:[%s4977_s9 + $0x210] sm:$0xff]  }
 0x484   :  { %3656 = vmatpush3.bf16.msra.mxu0 %v3939_v33  ;;  %3683 = vmatprep.subr.bf16.mxu1 %v3940_v34  ;;  %v2334_v33 = vrot.slane %v2301_v24, 2  ;;  %v2343_v34 = vrot.slane %v2304_v55, 2 }
 0x485   :  { %3657 = vmatprep.subr.bf16.mxu0 %v3941_v25  ;;  %v2333_v25 = vsel %vm548_vm2, %v4915_v41, %v2332_v17 }
 0x487   :  { %3684 = vmatpush3.bf16.msra.mxu1 %v3942_v23  ;;  %v2280_v23 = vsel %vm515_vm1, %v2272_v26, %v2279_v21 }
 0x488   :  { %3658 = vmatpush3.bf16.msra.mxu0 %v3943_v37  ;;  %3685 = vmatprep.subr.bf16.mxu1 %v3944_v38  ;;  %v2335_v37 = vrot.slane %v4783_v35, 2  ;;  %v2369_v38 = vpack.c.bf16 %v2333_v25, %v2327_v29  ;;  %v3958_v35 = vld [vmem:[%s4977_s9 + $0x220] sm:$0xff]  }
 0x489   :  { %3659 = vmatprep.subr.bf16.mxu0 %v3945_v27  ;;  %v2374_v27 = vpack.c.bf16 %v2280_v23, %v2273_v36 }
 0x48a   :  { %v2336_v39 = vsel %vm548_vm2, %v2334_v33, %v2335_v37  ;;  %v2344_v42 = vsel %vm548_vm2, %v2335_v37, %v2343_v34 }
 0x48b   :  { %3686 = vmatpush3.bf16.msra.mxu1 %v3946_v43  ;;  %v3957_v43 = vld [vmem:[%s4977_s9 + $0x218] sm:$0xff]   ;;  %v2376_v44 = vpack.c.bf16 %v2344_v42, %v2336_v39 }
 0x48c   :  { %3660 = vmatpush3.bf16.msra.mxu0 %v3947_v46  ;;  %3687 = vmatprep.subr.bf16.mxu1 %v3948_v47  ;;  %v3960_v46 = vld [vmem:[%s4977_s9 + $0x230] sm:$0xff]   ;;  %v2303_v47 = vld [vmem:[#allocation3 + $0x58] sm:$0xfc] }
 0x48d   :  { %3661 = vmatprep.subr.bf16.mxu0 %v3949_v48  ;;  %v2306_v48 = vld [vmem:[#allocation3 + $0x88] sm:$0x3]  ;;  %v2340_v49 = vrot.slane %v2303_v47, 2 }
 0x48e   :  { %v2347_v50 = vrot.slane %v2306_v48, 2 }
 0x48f   :  { %3688 = vmatpush3.bf16.msra.mxu1 %v3950_v54  ;;  %v2342_v51 = vsel %vm548_vm2, %v2340_v49, %v4915_v41 }
 0x490   :  { %3662 = vmatpush3.bf16.msra.mxu0 %v3951_v59  ;;  %3689 = vmatprep.subr.bf16.mxu1 %v3952_v60  ;;  %v2348_v52 = vsel %vm548_vm2, %v4915_v41, %v2347_v50 }
 0x491   :  { %3713 = vmatprep.subr.bf16.mxu0 %v3954_v61  ;;  %v2378_v53 = vpack.c.bf16 %v2348_v52, %v2342_v51 }
 0x493   :  { %3093 = vmatmul.mubr.bf16.vlgmr.msra.gmra.mrb[28].mxu0 %v2365_v14  ;;  %3690 = vmatpush3.bf16.msra.mxu1 %v3953_v8 }
 0x494   :  { %3714 = vmatpush3.bf16.msra.mxu0 %v3954_v61  ;;  %3100 = vmatprep.mubr.bf16.mxu0 %v2375_v12 }
 0x495   :  { %3715 = vmatprep.subr.bf16.mxu0 %v3955_v16 }
 0x496   :  { %3142 = vmatmul.mubr.bf16.vlgmr.msra.gmra.mrb[36].mxu1 %v2367_v28 }
 0x497   :  { %3149 = vmatprep.mubr.bf16.mxu1 %v2377_v30 }
 0x498   :  { %3716 = vmatpush3.bf16.msra.mxu0 %v3955_v16 }
 0x499   :  { %3717 = vmatprep.subr.bf16.mxu0 %v3956_v20 }
 0x49b   :  { %3101 = vmatmul.mubr.bf16.gmra.mrb[32].mxu0 %v2374_v27 }
 0x49c   :  { %3718 = vmatpush3.bf16.msra.mxu0 %v3956_v20  ;;  %3729 = vmatprep.mubr.bf16.mxu0 %v2369_v38 }
 0x49d   :  { %3719 = vmatprep.subr.bf16.mxu0 %v3957_v43 }
 0x49e   :  { %3150 = vmatmul.mubr.bf16.gmra.mrb[40].mxu1 %v2376_v44 }
 0x4a0   :  { %3720 = vmatpush3.bf16.msra.mxu0 %v3957_v43 }
 0x4a1   :  { %3721 = vmatprep.subr.bf16.mxu0 %v3958_v35 }
 0x4a4   :  { %3722 = vmatpush3.bf16.msra.mxu0 %v3958_v35 }
 0x4a5   :  { %3723 = vmatprep.subr.bf16.mxu0 %v3959_v45 }
 0x4a8   :  { %3724 = vmatpush3.bf16.msra.mxu0 %v3959_v45 }
 0x4a9   :  { %3725 = vmatprep.subr.bf16.mxu0 %v3960_v46 }
 0x4ac   :  { %3726 = vmatpush3.bf16.msra.mxu0 %v3960_v46 }
 0x4ad   :  { %3727 = vmatprep.subr.bf16.mxu0 %v3961_v0 }
 0x4b0   :  { %3728 = vmatpush3.bf16.msra.mxu0 %v3961_v0 }
 0x4b3   :  { %3730 = vmatmul.mubr.bf16.vlgmr.msra.gmra.mrb[36].mxu0 %v2378_v53 }
 0x545   :  { %v3607_v54 = vpop.f32.mrb[20].mxu0 }
 0x546   :  { %v3608_v57 = vpop.f32.mrb[21].mxu0 }
 0x547   :  { %v3609_v58 = vadd.f32 %v3608_v57, %v3607_v54  ;;  %v3610_v59 = vpop.f32.mrb[22].mxu0 }
 0x548   :  { %v3611_v60 = vpop.f32.mrb[23].mxu0 }
 0x549   :  { %v2997_v61 = vadd.f32 %v3609_v58, %v3386_v56  ;;  %v3612_v62 = vadd.f32 %v3611_v60, %v3610_v59  ;;  %v3635_v19 = vpop.f32.mrb[28].mxu1 }
 0x54a   :  { %v3636_v32 = vpop.f32.mrb[29].mxu1 }
 0x54b   :  { %v3000_v63 = vadd.f32 %v3612_v62, %v3386_v56  ;;  %v3637_v1 = vadd.f32 %v3636_v32, %v3635_v19  ;;  %v3638_v2 = vpop.f32.mrb[30].mxu1 }
 0x54c   :  { %v3639_v3 = vpop.f32.mrb[31].mxu1 }
 0x54d   :  { %v3046_v4 = vadd.f32 %v3637_v1, %v2997_v61  ;;  %v3640_v6 = vadd.f32 %v3639_v3, %v3638_v2  ;;  %v3613_v7 = vpop.f32.mrb[24].mxu0 }
 0x54e   :  { %v3614_v5 = vpop.f32.mrb[25].mxu0 }
 0x54f   :  { %v3049_v8 = vadd.f32 %v3640_v6, %v3000_v63  ;;  %v3615_v9 = vadd.f32 %v3614_v5, %v3613_v7  ;;  %v3616_v10 = vpop.f32.mrb[26].mxu0 }
 0x550   :  { %v3617_v11 = vpop.f32.mrb[27].mxu0 }
 0x551   :  { %v3005_v41 = vadd.f32 %v3615_v9, %v3386_v56  ;;  %v3618_v12 = vadd.f32 %v3617_v11, %v3616_v10  ;;  %v3641_v13 = vpop.f32.mrb[32].mxu1 }
 0x552   :  { %v3642_v14 = vpop.f32.mrb[33].mxu1 }
 0x553   :  { %v3008_v31 = vadd.f32 %v3618_v12, %v3386_v56  ;;  %v3643_v15 = vadd.f32 %v3642_v14, %v3641_v13  ;;  %v3644_v16 = vpop.f32.mrb[34].mxu1 }
 0x554   :  { %v3645_v17 = vpop.f32.mrb[35].mxu1 }
 0x555   :  { %v3054_v18 = vadd.f32 %v3643_v15, %v3005_v41  ;;  %v3646_v40 = vadd.f32 %v3645_v17, %v3644_v16 }
 0x557   :  { %v3057_v22 = vadd.f32 %v3646_v40, %v3008_v31 }
 0x566   :  { %v3663_v21 = vpop.f32.mrb[28].mxu0 }
 0x567   :  { %v3664_v24 = vpop.f32.mrb[29].mxu0 }
 0x568   :  { %v3665_v55 = vadd.f32 %v3664_v24, %v3663_v21  ;;  %v3666_v26 = vpop.f32.mrb[30].mxu0 }
 0x569   :  { %v3667_v28 = vpop.f32.mrb[31].mxu0  ;;  %v3691_v29 = vpop.f32.mrb[36].mxu1 }
 0x56a   :  { %v3095_v30 = vadd.f32 %v3665_v55, %v3046_v4  ;;  %v3668_v20 = vadd.f32 %v3667_v28, %v3666_v26  ;;  %v3692_v33 = vpop.f32.mrb[37].mxu1 }
 0x56b   :  { %v3693_v34 = vadd.f32 %v3692_v33, %v3691_v29  ;;  %v3694_v25 = vpop.f32.mrb[38].mxu1 }
 0x56c   :  { %v3098_v36 = vadd.f32 %v3668_v20, %v3049_v8  ;;  %v3695_v23 = vpop.f32.mrb[39].mxu1 }
 0x56d   :  { %v3696_v37 = vadd.f32 %v3695_v23, %v3694_v25  ;;  %v3144_v38 = vadd.f32 %v3693_v34, %v3095_v30 }
 0x56e   :  { %v3669_v27 = vpop.f32.mrb[32].mxu0 }
 0x56f   :  { %v3670_v39 = vpop.f32.mrb[33].mxu0  ;;  %v3147_v42 = vadd.f32 %v3696_v37, %v3098_v36 }
 0x570   :  { %v3671_v43 = vadd.f32 %v3670_v39, %v3669_v27  ;;  %v3672_v44 = vpop.f32.mrb[34].mxu0 }
 0x571   :  { %v3673_v35 = vpop.f32.mrb[35].mxu0  ;;  %v3697_v45 = vpop.f32.mrb[40].mxu1 }
 0x572   :  { %v3103_v46 = vadd.f32 %v3671_v43, %v3054_v18  ;;  %v3674_v47 = vadd.f32 %v3673_v35, %v3672_v44  ;;  %v3698_v48 = vpop.f32.mrb[41].mxu1 }
 0x573   :  { %v3699_v49 = vadd.f32 %v3698_v48, %v3697_v45  ;;  %v3700_v50 = vpop.f32.mrb[42].mxu1 }
 0x574   :  { %v3106_v0 = vadd.f32 %v3674_v47, %v3057_v22  ;;  %v3701_v51 = vpop.f32.mrb[43].mxu1 }
 0x575   :  { %v3702_v52 = vadd.f32 %v3701_v51, %v3700_v50  ;;  %v3152_v53 = vadd.f32 %v3699_v49, %v3103_v46 }
 0x577   :  { %v3155_v54 = vadd.f32 %v3702_v52, %v3106_v0 }
 0x586   :  { %v3731_v56 = vpop.f32.mrb[36].mxu0 }
 0x587   :  { %v3201_v57 = vadd.f32 %v3731_v56, %v3152_v53  ;;  %v3192_v58 = vpop.f32.mrb[37].mxu0 }
 0x588   :  { %v3193_v59 = vadd.f32 %v3192_v58, %v3144_v38  ;;  %v3732_v60 = vpop.f32.mrb[38].mxu0 }
 0x589   :  { %v3209_v61 = vmul.f32 0.5, %v3201_v57  ;;  %v3204_v62 = vadd.f32 %v3732_v60, %v3155_v54  ;;  %v3195_v19 = vpop.f32.mrb[39].mxu0 }
 0x58a   :  { %v3207_v32 = vmul.f32 0.5, %v3193_v59  ;;  %v3196_v63 = vadd.f32 %v3195_v19, %v3147_v42 }
 0x58b   :  { %3962 = vtanh.f32 %v3209_v61  ;;  %v3210_v1 = vmul.f32 0.5, %v3204_v62 }
 0x58c   :  { %3964 = vtanh.f32 %v3207_v32  ;;  %v3208_v2 = vmul.f32 0.5, %v3196_v63 }
 0x58d   :  { %3966 = vtanh.f32 %v3210_v1 }
 0x58e   :  { %3968 = vtanh.f32 %v3208_v2 }
 0x595   :  { %v3963_v3 = vpop.eup %3962 }
 0x596   :  { %v3965_v4 = vpop.eup %3964  ;;  %v3217_v6 = vadd.f32 1.0, %v3963_v3 }
 0x597   :  { %v3967_v7 = vpop.eup %3966  ;;  %v3215_v5 = vadd.f32 1.0, %v3965_v4 }
 0x598   :  { %v3969_v8 = vpop.eup %3968  ;;  %v3221_v9 = vmul.f32 0.5, %v3217_v6  ;;  %v3218_v10 = vadd.f32 1.0, %v3967_v7 }
 0x599   :  { %v3219_v11 = vmul.f32 0.5, %v3215_v5  ;;  %v3216_v41 = vadd.f32 1.0, %v3969_v8 }
 0x59a   :  { %3226 = vst.msk [vmem:[%s4979_s11 + $0x10] sm:$0xff] %vm3223_vm4, %v3221_v9  ;;  %v3222_v12 = vmul.f32 0.5, %v3218_v10 }
 0x59b   :  { %3224 = vst.msk [vmem:[%s4979_s11] sm:$0xff] %vm3223_vm4, %v3219_v11  ;;  %v3220_v13 = vmul.f32 0.5, %v3216_v41 }
 0x59c   :  { %3227 = vst.msk [vmem:[%s4979_s11 + $0x18] sm:$0xff] %vm3223_vm4, %v3222_v12 }
 0x59d   :  { %3225 = vst.msk [vmem:[%s4979_s11 + $0x8] sm:$0xff] %vm3223_vm4, %v3220_v13 }
 0x59e   :  { %3232 = vsyncpa [#allocation5], 1 }
 0x59f   :  { %3233 = vsyncpa [#allocation7], 1 }
 0x5a0   :  { %3234 = vsyncpa [#allocation10], 1 }
 0x5a1   :  { %3235 = vsyncpa [#allocation13], 1 }

</bundles_post_ra>
